<compile_context>
chip_gen: v5e
topology: v5e:2x2
jax: 0.10.0
libtpu: 0.0.40
codegen_flags: <defaults>
</compile_context>

<pallas_src>
import functools
import math

import jax
import jax.numpy as jnp
from jax.experimental import pallas as pl
from jax.experimental.pallas import tpu as pltpu


def _conv2d_zeros_kernel(halo_ref, scale_ref, x_mid_ref, x_top_ref, x_bot_ref,
                         w_ref, b_ref, o_ref, xpad_ref, patch_ref, *,
                         logscale_factor):
    # halo_ref  : (row_tiles, 2) i32, SMEM (scalar prefetch; used by index maps)
    # scale_ref : (1, 1)              f32, SMEM
    # x_mid_ref : (TH, W, Cin)        f32  current row block
    # x_top_ref : (1, W, Cin)         f32  row above the block (edge-clamped)
    # x_bot_ref : (1, W, Cin)         f32  row below the block (edge-clamped)
    # w_ref     : (9*Cin, Np)         bf16 flattened 3x3 weights, Cout padded
    # b_ref     : (1, Np)             f32  bias, Cout padded with zeros
    # o_ref     : (TH*W, Np)          f32  lane-dense output block
    # xpad_ref  : (TH+2, W+2, Cin)    f32  VMEM scratch, replicate-padded tile
    # patch_ref : (TH, W, 9*Cin)      f32  VMEM scratch, im2col patch matrix
    del halo_ref  # consumed only by the BlockSpec index maps
    TH, W, Cin = x_mid_ref.shape
    K = 9 * Cin

    # ---- replicate-padded tile, built in VMEM (no HBM-level pad copy) -------
    xpad_ref[1:TH + 1, 1:W + 1, :] = x_mid_ref[...]
    xpad_ref[0:1, 1:W + 1, :] = x_top_ref[...]
    xpad_ref[TH + 1:TH + 2, 1:W + 1, :] = x_bot_ref[...]
    xpad_ref[:, 0:1, :] = xpad_ref[:, 1:2, :]              # replicate left col
    xpad_ref[:, W + 1:W + 2, :] = xpad_ref[:, W:W + 1, :]  # replicate right col

    # ---- im2col: 9 shifted copies into one patch matrix ---------------------
    for kh in range(3):
        for kw in range(3):
            t = kh * 3 + kw
            patch_ref[:, :, t * Cin:(t + 1) * Cin] = xpad_ref[kh:kh + TH,
                                                              kw:kw + W, :]

    # ---- single MXU matmul: (TH*W, 9*Cin) @ (9*Cin, Np), bf16 in / f32 acc --
    patch = patch_ref[...].reshape(TH * W, K).astype(jnp.bfloat16)
    acc = jnp.dot(patch, w_ref[...], preferred_element_type=jnp.float32)

    # ---- epilogue: bias + exp(clamp(scale) * logscale_factor), f32 ----------
    s = jnp.clip(scale_ref[0, 0], -4.0, math.log(4.0)) * logscale_factor
    o_ref[...] = ((acc + b_ref[...]) * jnp.exp(s)).astype(o_ref.dtype)


def _pick_block_rows(H, W, Cin):
    """Largest divisor of H whose row block keeps the im2col scratch small."""
    m_budget = min(2048, max(W, (4 * 1024 * 1024) // max(1, 9 * Cin * 4)))
    best = 1
    for th in range(1, H + 1):
        if H % th == 0 and th * W <= m_budget:
            best = th
    return best


def conv2d_zeros_forward(x_nchw, weight_oihw, bias, scale, logscale_factor=1,
                         block_rows=None):
    """x_nchw: [B, Cin, H, W]; weight_oihw: [Cout, Cin, 3, 3]; bias: [Cout];
    scale: [1, 1, 1, 1].  Returns [B, Cout, H, W] (same as the PyTorch module)."""
    B, Cin, H, W = x_nchw.shape
    Cout = weight_oihw.shape[0]
    K = 9 * Cin
    Np = ((Cout + 127) // 128) * 128           # lane-dense output width

    if block_rows is None:
        block_rows = _pick_block_rows(H, W, Cin)
    assert H % block_rows == 0
    TH = block_rows
    n_row_tiles = H // TH

    # ---- glue: layout + parameter packing (pure prep, no module compute) ----
    x_nhwc = jnp.transpose(x_nchw, (0, 2, 3, 1)).astype(jnp.float32)
    # (Cout, Cin, 3, 3) -> (3, 3, Cin, Cout) -> (9*Cin, Cout) -> pad N to Np.
    w_mat = jnp.transpose(weight_oihw, (2, 3, 1, 0)).reshape(K, Cout)
    w_mat = jnp.zeros((K, Np), jnp.bfloat16).at[:, :Cout].set(
        w_mat.astype(jnp.bfloat16))
    b_pad = jnp.zeros((1, Np), jnp.float32).at[0, :Cout].set(
        bias.astype(jnp.float32))
    scale_2d = scale.reshape(1, 1).astype(jnp.float32)

    # Pre-clamped halo row indices (replicate padding along H), scalar-prefetched.
    r_idx = jnp.arange(n_row_tiles, dtype=jnp.int32)
    halo_rows = jnp.stack(
        [jnp.maximum(r_idx * TH - 1, 0),
         jnp.minimum(r_idx * TH + TH, H - 1)], axis=1).astype(jnp.int32)

    kernel = functools.partial(_conv2d_zeros_kernel,
                               logscale_factor=float(logscale_factor))

    out = pl.pallas_call(
        kernel,
        out_shape=jax.ShapeDtypeStruct((B, H * W, Np), jnp.float32),
        grid_spec=pltpu.PrefetchScalarGridSpec(
            num_scalar_prefetch=1,                       # halo_rows -> SMEM
            grid=(B, n_row_tiles),
            in_specs=[
                pl.BlockSpec(memory_space=pltpu.MemorySpace.SMEM),     # scale
                pl.BlockSpec((None, TH, W, Cin),
                             lambda b, r, halo: (b, r, 0, 0)),         # rows
                pl.BlockSpec((None, 1, W, Cin),
                             lambda b, r, halo: (b, halo[r, 0], 0, 0)),  # top halo
                pl.BlockSpec((None, 1, W, Cin),
                             lambda b, r, halo: (b, halo[r, 1], 0, 0)),  # bot halo
                pl.BlockSpec((K, Np), lambda b, r, halo: (0, 0)),      # weights
                pl.BlockSpec((1, Np), lambda b, r, halo: (0, 0)),      # bias
            ],
            out_specs=pl.BlockSpec((None, TH * W, Np),
                                   lambda b, r, halo: (b, r, 0)),
            scratch_shapes=[
                pltpu.VMEM((TH + 2, W + 2, Cin), jnp.float32),   # padded tile
                pltpu.VMEM((TH, W, K), jnp.float32),             # im2col patch
            ],
        ),
        compiler_params=pltpu.CompilerParams(
            dimension_semantics=("parallel", "parallel"),
            vmem_limit_bytes=64 * 1024 * 1024,
        ),
    )(halo_rows, scale_2d, x_nhwc, x_nhwc, x_nhwc, w_mat, b_pad)

    # Drop the lane padding and go back to NCHW.
    out_nhwc = out[:, :, :Cout].reshape(B, H, W, Cout)
    return jnp.transpose(out_nhwc, (0, 3, 1, 2))


def _reference(x_nchw, weight_oihw, bias, scale, logscale_factor=1):
    """Pure-JAX reference (mirrors the PyTorch forward), f32 end to end."""
    x_nhwc = jnp.transpose(x_nchw, (0, 2, 3, 1)).astype(jnp.float32)
    x_pad = jnp.pad(x_nhwc, ((0, 0), (1, 1), (1, 1), (0, 0)), mode="edge")
    w_hwio = jnp.transpose(weight_oihw, (2, 3, 1, 0))
    y = jax.lax.conv_general_dilated(
        x_pad, w_hwio, window_strides=(1, 1), padding="VALID",
        dimension_numbers=("NHWC", "HWIO", "NHWC"),
    ) + bias.reshape(1, 1, 1, -1)
    mult = jnp.exp(jnp.clip(scale.reshape(()), -4.0, math.log(4.0)) * logscale_factor)
    return jnp.transpose(y * mult, (0, 3, 1, 2))


if __name__ == "__main__":
    B, Cin, Cout, H, W = 2, 4, 4, 16, 16
    logscale_factor = 1

    key = jax.random.PRNGKey(0)
    kx, kw, kb, ks = jax.random.split(key, 4)

    x = jax.random.normal(kx, (B, Cin, H, W), dtype=jnp.float32)

    # Parameter shapes from the module's __init__ (Conv2d(Cin, Cout, 3) + scale
    # (1,1,1,1)).  The module zero-initializes them; here we use small
    # deterministic values so the kernel does non-trivial work (forward
    # semantics are identical either way).
    weight = 0.1 * jax.random.normal(kw, (Cout, Cin, 3, 3), dtype=jnp.float32)
    bias = 0.1 * jax.random.normal(kb, (Cout,), dtype=jnp.float32)
    scale = 0.1 * jax.random.normal(ks, (1, 1, 1, 1), dtype=jnp.float32)

    out = conv2d_zeros_forward(x, weight, bias, scale, logscale_factor)
    out = jax.block_until_ready(out)

    ref = _reference(x, weight, bias, scale, logscale_factor)
    assert out.shape == (B, Cout, H, W)
    # bf16 MXU operands (f32 accumulation) -> compare with a relaxed tolerance.
    assert jnp.allclose(out, ref, atol=1e-2, rtol=1e-2), "mismatch vs reference"

    print("KERNEL_OK")
</pallas_src>

<mosaic_0001>
module attributes {stable_mosaic.version = 11 : i64} {
  func.func @_conv2d_zeros_kernel(%arg0: i32, %arg1: i32, %arg2: memref<1x2xi32, #tpu.memory_space<smem>>, %arg3: memref<1x1xf32, #tpu.memory_space<smem>>, %arg4: memref<1x16x16x4xf32, #tpu.memory_space<vmem>>, %arg5: memref<1x1x16x4xf32, #tpu.memory_space<vmem>>, %arg6: memref<1x1x16x4xf32, #tpu.memory_space<vmem>>, %arg7: memref<36x128xbf16, #tpu.memory_space<vmem>>, %arg8: memref<1x128xf32, #tpu.memory_space<vmem>>, %arg9: memref<1x256x128xf32, #tpu.memory_space<vmem>>, %arg10: memref<18x18x4xf32, #tpu.memory_space<vmem>>, %arg11: memref<16x16x36xf32, #tpu.memory_space<vmem>>) attributes {dimension_semantics = [#tpu.dimension_semantics<parallel>, #tpu.dimension_semantics<parallel>], iteration_bounds = array<i64: 2, 1>, scalar_prefetch = 1 : i64, scratch_operands = 2 : i64, tpu.core_type = #tpu.core_type<tc>, window_params = [{transform_indices = @transform_0, window_bounds = array<i64: 1, 1>}, {transform_indices = @transform_1, window_bounds = array<i64: 1, 16, 16, 4>}, {transform_indices = @transform_2, window_bounds = array<i64: 1, 1, 16, 4>}, {transform_indices = @transform_3, window_bounds = array<i64: 1, 1, 16, 4>}, {pipeline_mode = #tpu.pipeline_mode<synchronous>, transform_indices = @transform_4, window_bounds = array<i64: 36, 128>}, {pipeline_mode = #tpu.pipeline_mode<synchronous>, transform_indices = @transform_5, window_bounds = array<i64: 1, 128>}, {transform_indices = @transform_6, window_bounds = array<i64: 1, 256, 128>}]} {
    %c0 = arith.constant 0 : index
    %c0_0 = arith.constant 0 : index
    %c0_1 = arith.constant 0 : index
    %c0_2 = arith.constant 0 : index
    %0 = vector.load %arg4[%c0, %c0_0, %c0_1, %c0_2] : memref<1x16x16x4xf32, #tpu.memory_space<vmem>>, vector<1x16x16x4xf32>
    %1 = vector.shape_cast %0 : vector<1x16x16x4xf32> to vector<16x16x4xf32>
    %c1 = arith.constant 1 : index
    %c1_3 = arith.constant 1 : index
    %c0_4 = arith.constant 0 : index
    %2 = vector.load %arg10[%c1, %c1_3, %c0_4] : memref<18x18x4xf32, #tpu.memory_space<vmem>>, vector<16x16x4xf32>
    tpu.vector_store %arg10[%c1, %c1_3, %c0_4], %1 {strides = array<i32>} : memref<18x18x4xf32, #tpu.memory_space<vmem>>, vector<16x16x4xf32>,
    %c0_5 = arith.constant 0 : index
    %c0_6 = arith.constant 0 : index
    %c0_7 = arith.constant 0 : index
    %c0_8 = arith.constant 0 : index
    %3 = vector.load %arg5[%c0_5, %c0_6, %c0_7, %c0_8] : memref<1x1x16x4xf32, #tpu.memory_space<vmem>>, vector<1x1x16x4xf32>
    %4 = vector.shape_cast %3 : vector<1x1x16x4xf32> to vector<1x16x4xf32>
    %c0_9 = arith.constant 0 : index
    %c1_10 = arith.constant 1 : index
    %c0_11 = arith.constant 0 : index
    %5 = vector.load %arg10[%c0_9, %c1_10, %c0_11] : memref<18x18x4xf32, #tpu.memory_space<vmem>>, vector<1x16x4xf32>
    tpu.vector_store %arg10[%c0_9, %c1_10, %c0_11], %4 {strides = array<i32>} : memref<18x18x4xf32, #tpu.memory_space<vmem>>, vector<1x16x4xf32>,
    %c0_12 = arith.constant 0 : index
    %c0_13 = arith.constant 0 : index
    %c0_14 = arith.constant 0 : index
    %c0_15 = arith.constant 0 : index
    %6 = vector.load %arg6[%c0_12, %c0_13, %c0_14, %c0_15] : memref<1x1x16x4xf32, #tpu.memory_space<vmem>>, vector<1x1x16x4xf32>
    %7 = vector.shape_cast %6 : vector<1x1x16x4xf32> to vector<1x16x4xf32>
    %c17 = arith.constant 17 : index
    %c1_16 = arith.constant 1 : index
    %c0_17 = arith.constant 0 : index
    %8 = vector.load %arg10[%c17, %c1_16, %c0_17] : memref<18x18x4xf32, #tpu.memory_space<vmem>>, vector<1x16x4xf32>
    tpu.vector_store %arg10[%c17, %c1_16, %c0_17], %7 {strides = array<i32>} : memref<18x18x4xf32, #tpu.memory_space<vmem>>, vector<1x16x4xf32>,
    %c0_18 = arith.constant 0 : index
    %c1_19 = arith.constant 1 : index
    %c0_20 = arith.constant 0 : index
    %9 = vector.load %arg10[%c0_18, %c1_19, %c0_20] : memref<18x18x4xf32, #tpu.memory_space<vmem>>, vector<18x1x4xf32>
    %c0_21 = arith.constant 0 : index
    %c0_22 = arith.constant 0 : index
    %c0_23 = arith.constant 0 : index
    %10 = vector.load %arg10[%c0_21, %c0_22, %c0_23] : memref<18x18x4xf32, #tpu.memory_space<vmem>>, vector<18x1x4xf32>
    tpu.vector_store %arg10[%c0_21, %c0_22, %c0_23], %9 {strides = array<i32>} : memref<18x18x4xf32, #tpu.memory_space<vmem>>, vector<18x1x4xf32>,
    %c0_24 = arith.constant 0 : index
    %c16 = arith.constant 16 : index
    %c0_25 = arith.constant 0 : index
    %11 = vector.load %arg10[%c0_24, %c16, %c0_25] : memref<18x18x4xf32, #tpu.memory_space<vmem>>, vector<18x1x4xf32>
    %c0_26 = arith.constant 0 : index
    %c17_27 = arith.constant 17 : index
    %c0_28 = arith.constant 0 : index
    %12 = vector.load %arg10[%c0_26, %c17_27, %c0_28] : memref<18x18x4xf32, #tpu.memory_space<vmem>>, vector<18x1x4xf32>
    tpu.vector_store %arg10[%c0_26, %c17_27, %c0_28], %11 {strides = array<i32>} : memref<18x18x4xf32, #tpu.memory_space<vmem>>, vector<18x1x4xf32>,
    %c0_29 = arith.constant 0 : index
    %c0_30 = arith.constant 0 : index
    %c0_31 = arith.constant 0 : index
    %13 = vector.load %arg10[%c0_29, %c0_30, %c0_31] : memref<18x18x4xf32, #tpu.memory_space<vmem>>, vector<16x16x4xf32>
    %c0_32 = arith.constant 0 : index
    %c0_33 = arith.constant 0 : index
    %c0_34 = arith.constant 0 : index
    %14 = vector.load %arg11[%c0_32, %c0_33, %c0_34] : memref<16x16x36xf32, #tpu.memory_space<vmem>>, vector<16x16x4xf32>
    tpu.vector_store %arg11[%c0_32, %c0_33, %c0_34], %13 {strides = array<i32>} : memref<16x16x36xf32, #tpu.memory_space<vmem>>, vector<16x16x4xf32>,
    %c0_35 = arith.constant 0 : index
    %c1_36 = arith.constant 1 : index
    %c0_37 = arith.constant 0 : index
    %15 = vector.load %arg10[%c0_35, %c1_36, %c0_37] : memref<18x18x4xf32, #tpu.memory_space<vmem>>, vector<16x16x4xf32>
    %c0_38 = arith.constant 0 : index
    %c0_39 = arith.constant 0 : index
    %c4 = arith.constant 4 : index
    %16 = vector.load %arg11[%c0_38, %c0_39, %c4] : memref<16x16x36xf32, #tpu.memory_space<vmem>>, vector<16x16x4xf32>
    tpu.vector_store %arg11[%c0_38, %c0_39, %c4], %15 {strides = array<i32>} : memref<16x16x36xf32, #tpu.memory_space<vmem>>, vector<16x16x4xf32>,
    %c0_40 = arith.constant 0 : index
    %c2 = arith.constant 2 : index
    %c0_41 = arith.constant 0 : index
    %17 = vector.load %arg10[%c0_40, %c2, %c0_41] : memref<18x18x4xf32, #tpu.memory_space<vmem>>, vector<16x16x4xf32>
    %c0_42 = arith.constant 0 : index
    %c0_43 = arith.constant 0 : index
    %c8 = arith.constant 8 : index
    %18 = vector.load %arg11[%c0_42, %c0_43, %c8] : memref<16x16x36xf32, #tpu.memory_space<vmem>>, vector<16x16x4xf32>
    tpu.vector_store %arg11[%c0_42, %c0_43, %c8], %17 {strides = array<i32>} : memref<16x16x36xf32, #tpu.memory_space<vmem>>, vector<16x16x4xf32>,
    %c1_44 = arith.constant 1 : index
    %c0_45 = arith.constant 0 : index
    %c0_46 = arith.constant 0 : index
    %19 = vector.load %arg10[%c1_44, %c0_45, %c0_46] : memref<18x18x4xf32, #tpu.memory_space<vmem>>, vector<16x16x4xf32>
    %c0_47 = arith.constant 0 : index
    %c0_48 = arith.constant 0 : index
    %c12 = arith.constant 12 : index
    %20 = vector.load %arg11[%c0_47, %c0_48, %c12] : memref<16x16x36xf32, #tpu.memory_space<vmem>>, vector<16x16x4xf32>
    tpu.vector_store %arg11[%c0_47, %c0_48, %c12], %19 {strides = array<i32>} : memref<16x16x36xf32, #tpu.memory_space<vmem>>, vector<16x16x4xf32>,
    %c1_49 = arith.constant 1 : index
    %c1_50 = arith.constant 1 : index
    %c0_51 = arith.constant 0 : index
    %21 = vector.load %arg10[%c1_49, %c1_50, %c0_51] : memref<18x18x4xf32, #tpu.memory_space<vmem>>, vector<16x16x4xf32>
    %c0_52 = arith.constant 0 : index
    %c0_53 = arith.constant 0 : index
    %c16_54 = arith.constant 16 : index
    %22 = vector.load %arg11[%c0_52, %c0_53, %c16_54] : memref<16x16x36xf32, #tpu.memory_space<vmem>>, vector<16x16x4xf32>
    tpu.vector_store %arg11[%c0_52, %c0_53, %c16_54], %21 {strides = array<i32>} : memref<16x16x36xf32, #tpu.memory_space<vmem>>, vector<16x16x4xf32>,
    %c1_55 = arith.constant 1 : index
    %c2_56 = arith.constant 2 : index
    %c0_57 = arith.constant 0 : index
    %23 = vector.load %arg10[%c1_55, %c2_56, %c0_57] : memref<18x18x4xf32, #tpu.memory_space<vmem>>, vector<16x16x4xf32>
    %c0_58 = arith.constant 0 : index
    %c0_59 = arith.constant 0 : index
    %c20 = arith.constant 20 : index
    %24 = vector.load %arg11[%c0_58, %c0_59, %c20] : memref<16x16x36xf32, #tpu.memory_space<vmem>>, vector<16x16x4xf32>
    tpu.vector_store %arg11[%c0_58, %c0_59, %c20], %23 {strides = array<i32>} : memref<16x16x36xf32, #tpu.memory_space<vmem>>, vector<16x16x4xf32>,
    %c2_60 = arith.constant 2 : index
    %c0_61 = arith.constant 0 : index
    %c0_62 = arith.constant 0 : index
    %25 = vector.load %arg10[%c2_60, %c0_61, %c0_62] : memref<18x18x4xf32, #tpu.memory_space<vmem>>, vector<16x16x4xf32>
    %c0_63 = arith.constant 0 : index
    %c0_64 = arith.constant 0 : index
    %c24 = arith.constant 24 : index
    %26 = vector.load %arg11[%c0_63, %c0_64, %c24] : memref<16x16x36xf32, #tpu.memory_space<vmem>>, vector<16x16x4xf32>
    tpu.vector_store %arg11[%c0_63, %c0_64, %c24], %25 {strides = array<i32>} : memref<16x16x36xf32, #tpu.memory_space<vmem>>, vector<16x16x4xf32>,
    %c2_65 = arith.constant 2 : index
    %c1_66 = arith.constant 1 : index
    %c0_67 = arith.constant 0 : index
    %27 = vector.load %arg10[%c2_65, %c1_66, %c0_67] : memref<18x18x4xf32, #tpu.memory_space<vmem>>, vector<16x16x4xf32>
    %c0_68 = arith.constant 0 : index
    %c0_69 = arith.constant 0 : index
    %c28 = arith.constant 28 : index
    %28 = vector.load %arg11[%c0_68, %c0_69, %c28] : memref<16x16x36xf32, #tpu.memory_space<vmem>>, vector<16x16x4xf32>
    tpu.vector_store %arg11[%c0_68, %c0_69, %c28], %27 {strides = array<i32>} : memref<16x16x36xf32, #tpu.memory_space<vmem>>, vector<16x16x4xf32>,
    %c2_70 = arith.constant 2 : index
    %c2_71 = arith.constant 2 : index
    %c0_72 = arith.constant 0 : index
    %29 = vector.load %arg10[%c2_70, %c2_71, %c0_72] : memref<18x18x4xf32, #tpu.memory_space<vmem>>, vector<16x16x4xf32>
    %c0_73 = arith.constant 0 : index
    %c0_74 = arith.constant 0 : index
    %c32 = arith.constant 32 : index
    %30 = vector.load %arg11[%c0_73, %c0_74, %c32] : memref<16x16x36xf32, #tpu.memory_space<vmem>>, vector<16x16x4xf32>
    tpu.vector_store %arg11[%c0_73, %c0_74, %c32], %29 {strides = array<i32>} : memref<16x16x36xf32, #tpu.memory_space<vmem>>, vector<16x16x4xf32>,
    %c0_75 = arith.constant 0 : index
    %c0_76 = arith.constant 0 : index
    %c0_77 = arith.constant 0 : index
    %31 = vector.load %arg11[%c0_75, %c0_76, %c0_77] : memref<16x16x36xf32, #tpu.memory_space<vmem>>, vector<16x16x36xf32>
    %32 = vector.shape_cast %31 : vector<16x16x36xf32> to vector<256x36xf32>
    %33 = arith.truncf %32 : vector<256x36xf32> to vector<256x36xbf16>
    %c0_78 = arith.constant 0 : index
    %c0_79 = arith.constant 0 : index
    %34 = vector.load %arg7[%c0_78, %c0_79] : memref<36x128xbf16, #tpu.memory_space<vmem>>, vector<36x128xbf16>
    %cst = arith.constant dense<0.000000e+00> : vector<256x128xf32>
    %35 = tpu.matmul %33, %34, %cst {dimension_numbers = #tpu.dot_dimension_numbers<[1], [0], [0], [1], [0, 0, 1, 1], [], []>} : vector<256x36xbf16>, vector<36x128xbf16>, vector<256x128xf32> -> vector<256x128xf32>
    %c0_80 = arith.constant 0 : index
    %c0_81 = arith.constant 0 : index
    %36 = memref.load %arg3[%c0_80, %c0_81] : memref<1x1xf32, #tpu.memory_space<smem>>
    %cst_82 = arith.constant -4.000000e+00 : f32
    %cst_83 = arith.constant 1.38629436 : f32
    %37 = arith.maximumf %cst_82, %36 : f32
    %38 = arith.minimumf %cst_83, %37 : f32
    %cst_84 = arith.constant 1.000000e+00 : f32
    %39 = arith.mulf %38, %cst_84 : f32
    %c0_85 = arith.constant 0 : index
    %c0_86 = arith.constant 0 : index
    %40 = vector.load %arg8[%c0_85, %c0_86] : memref<1x128xf32, #tpu.memory_space<vmem>>, vector<1x128xf32>
    %41 = vector.broadcast %40 : vector<1x128xf32> to vector<256x128xf32>
    %42 = arith.addf %35, %41 : vector<256x128xf32>
    %43 = math.exp %39 : f32
    %44 = vector.broadcast %43 : f32 to vector<256x128xf32>
    %45 = arith.mulf %42, %44 : vector<256x128xf32>
    %c0_87 = arith.constant 0 : index
    %c0_88 = arith.constant 0 : index
    %c0_89 = arith.constant 0 : index
    %46 = vector.load %arg9[%c0_87, %c0_88, %c0_89] : memref<1x256x128xf32, #tpu.memory_space<vmem>>, vector<1x256x128xf32>
    %47 = vector.shape_cast %46 : vector<1x256x128xf32> to vector<256x128xf32>
    %48 = vector.shape_cast %45 : vector<256x128xf32> to vector<1x256x128xf32>
    tpu.vector_store %arg9[%c0_87, %c0_88, %c0_89], %48 {strides = array<i32>} : memref<1x256x128xf32, #tpu.memory_space<vmem>>, vector<1x256x128xf32>,
    return
  }
  func.func @transform_0(%arg0: i32, %arg1: i32, %arg2: memref<1x2xi32, #tpu.memory_space<smem>>) -> (i32, i32) {
    %c0_i32 = arith.constant 0 : i32
    %c0_i32_0 = arith.constant 0 : i32
    %c0_i32_1 = arith.constant 0 : i32
    return %c0_i32, %c0_i32_0 : i32, i32
  }
  func.func @transform_1(%arg0: i32, %arg1: i32, %arg2: memref<1x2xi32, #tpu.memory_space<smem>>) -> (i32, i32, i32, i32) {
    %c0_i32 = arith.constant 0 : i32
    %c0_i32_0 = arith.constant 0 : i32
    %c0_i32_1 = arith.constant 0 : i32
    return %arg0, %arg1, %c0_i32, %c0_i32_0 : i32, i32, i32, i32
  }
  func.func @transform_2(%arg0: i32, %arg1: i32, %arg2: memref<1x2xi32, #tpu.memory_space<smem>>) -> (i32, i32, i32, i32) {
    %0 = arith.index_cast %arg1 : i32 to index
    %c0 = arith.constant 0 : index
    %1 = memref.load %arg2[%0, %c0] : memref<1x2xi32, #tpu.memory_space<smem>>
    %c0_i32 = arith.constant 0 : i32
    %c0_i32_0 = arith.constant 0 : i32
    %c0_i32_1 = arith.constant 0 : i32
    return %arg0, %1, %c0_i32, %c0_i32_0 : i32, i32, i32, i32
  }
  func.func @transform_3(%arg0: i32, %arg1: i32, %arg2: memref<1x2xi32, #tpu.memory_space<smem>>) -> (i32, i32, i32, i32) {
    %0 = arith.index_cast %arg1 : i32 to index
    %c1 = arith.constant 1 : index
    %1 = memref.load %arg2[%0, %c1] : memref<1x2xi32, #tpu.memory_space<smem>>
    %c0_i32 = arith.constant 0 : i32
    %c0_i32_0 = arith.constant 0 : i32
    %c0_i32_1 = arith.constant 0 : i32
    return %arg0, %1, %c0_i32, %c0_i32_0 : i32, i32, i32, i32
  }
  func.func @transform_4(%arg0: i32, %arg1: i32, %arg2: memref<1x2xi32, #tpu.memory_space<smem>>) -> (i32, i32) {
    %c0_i32 = arith.constant 0 : i32
    %c0_i32_0 = arith.constant 0 : i32
    %c0_i32_1 = arith.constant 0 : i32
    return %c0_i32, %c0_i32_0 : i32, i32
  }
  func.func @transform_5(%arg0: i32, %arg1: i32, %arg2: memref<1x2xi32, #tpu.memory_space<smem>>) -> (i32, i32) {
    %c0_i32 = arith.constant 0 : i32
    %c0_i32_0 = arith.constant 0 : i32
    %c0_i32_1 = arith.constant 0 : i32
    return %c0_i32, %c0_i32_0 : i32, i32
  }
  func.func @transform_6(%arg0: i32, %arg1: i32, %arg2: memref<1x2xi32, #tpu.memory_space<smem>>) -> (i32, i32, i32) {
    %c0_i32 = arith.constant 0 : i32
    %c0_i32_0 = arith.constant 0 : i32
    return %arg0, %arg1, %c0_i32 : i32, i32, i32
  }
}

</mosaic_0001>

<bundles_post_ra>
// kernel: tpu_custom_call.1
= control target key start
LH: loop header
LB: loop body
LE: loop exit
PB: predicated region body
PF: predicated region fallthrough
CT: control target
= control target key end

     0   :  { %s2808_s29 = smov [#allocation5]   ;;  %s4140_s0 = inlined_call_operand.vmem [shape: s32[1,2], index: 0, kind: input, shape index: {}]   ;;  %s4141_s1 = inlined_call_operand.<no memory space> [shape: f32[1,1], index: 1, kind: input, shape index: {}]   ;;  %s4142_s2 = inlined_call_operand.vmem [shape: f32[2,16,16,4], index: 2, kind: input, shape index: {}]   ;;  %s4143_s3 = inlined_call_operand.vmem [shape: f32[2,16,16,4], index: 3, kind: input, shape index: {}]   ;;  %s4144_s4 = inlined_call_operand.vmem [shape: f32[2,16,16,4], index: 4, kind: input, shape index: {}]   ;;  %s4145_s5 = inlined_call_operand.vmem [shape: bf16[36,128], index: 5, kind: input, shape index: {}]   ;;  %s4146_s6 = inlined_call_operand.vmem [shape: f32[1,128], index: 6, kind: input, shape index: {}]   ;;  %s4147_s7 = inlined_call_operand.hbm [shape: f32[2,256,128], index: 7, kind: output, shape index: {}]  }
   0x1   :  { %s13_s26 = sshll.u32 %s4140_s0, 4  ;;  %17 = sst [smem:[#allocation6]] %s4141_s1  ;;  %s14_s26 = int_to_ptr.vmem [resolvable:$true] %s13_s26 }
   0x2   :  { %16 = dma.vmem_to_smem %s14_s26, 16, %s2808_s29, [#allocation4] }
   0x3   :  { %2778 = dma.done.wait [#allocation4], 16 }
   0x4   :  { %2779 = vsyncadd [#allocation4], 4294967280 }
   0x5   :  { %20 = sfence }
   0x6   :  { %21 = vsyncpa [#allocation8], 0 }
   0x7   :  { %23 = vsyncpa [#allocation8 + $0x1], 0  ;;  %s2866_s30 = smov 0   ;;  %s2868_s8 = smov 0  }
   0x8   :  { %s2870_s9 = smov 0   ;;  %s2872_s10 = smov 0  }
   0x9   :  { %s2874_s0 = smov 0   ;;  %s2876_s11 = smov 0  }
   0xa LB: > { %s2583_s1 = sadd.s32 4294967295, %s2806_s11   ;;  %s2584_s12 = sadd.s32 4294967294, %s2806_s11   ;;  %s2806_s11 = sphi %s2876_s11, %s29_s11   ;;  %s2802_s0 = sphi %s2874_s0, %s4199_s0   ;;  %s2798_s10 = sphi %s2872_s10, %s4198_s10   ;;  %s2794_s9 = sphi %s2870_s9, %s4197_s9   ;;  %s2790_s8 = sphi %s2868_s8, %s4196_s8   ;;  %s2786_s30 = sphi %s2866_s30, %s4195_s30  }
   0xb   : > { %s41_s13 = sadd.s32 1, %s2802_s0  ;;  %s207_s14 = sadd.s32 1, %s2794_s9 }
   0xc   : > { %p43_p0 = scmp.ge.s32.totalorder %s41_s13, 2  ;;  %p217_p1 = scmp.ne.s32.totalorder %s2794_s9, %s2790_s8 }
   0xd   : > { %p218_p2 = scmp.eq.s32.totalorder %s2583_s1, 1  ;;  %p223_p3 = scmp.ne.s32.totalorder %s2790_s8, %s2786_s30 }
   0xe   : > { %s4201_s13 = smov (%p43_p0, %s41_s13), 0  ;;  %p224_p5 = scmp.eq.s32.totalorder %s2584_s12, 1 }
   0xf   : > { %p2906_p4 = por %p218_p2, %p217_p1  ;;  %s202_s16 = ssub.s32 %s2802_s0, %s4201_s13 }
  0x10   : > { %p2589_p6 = scmp.ge.s32.totalorder %s2806_s11, 1  ;;  %p205_p7 = scmp.eq.s32.totalorder %s202_s16, 0 }
  0x11   : > { %p2913_p8 = por %p224_p5, %p223_p3  ;;  %p299_p9 = scmp.lt.s32.totalorder %s2806_s11, 3 }
  0x12   : > { %s2919_s18 = scalar_select %p205_p7, %s2794_s9, %s207_s14  }
  0x13   : > { %p300_p10 = pnand %p2589_p6, %p299_p9 }
  0x15   : > { %303 = sbr.rel (%p300_p10) target bundleno = 989 (0x3dd), region = 44 }
  0x1a   : > { %p358_p11 = scmp.lt.s32.totalorder %s2798_s10, 1  ;;  %s369_s19 = sld [smem:[#allocation5]]  ;;  %vm431_vm0 = vcmask 31744   ;;  %vm491_vm1 = vcmask 24576   ;;  %vm770_vm2 = vcmask 64544   ;;  %vm963_vm3 = vcmask 97344  }
  0x1b   : > { %s2809_s14 = smov 4   ;;  %s2810_s16 = smov 8   ;;  %vm1156_vm4 = vcmask 130144   ;;  %vm1349_vm5 = vcmask 162944   ;;  %vm1542_vm6 = vcmask 195744   ;;  %vm1736_vm7 = vcmask 228544  }
  0x1c   : > { %s2923_s20 = scalar_select %p358_p11, %s2798_s10, 1  ;;  %vm2279_vm8 = vcmask 1041408   ;;  %vm1929_vm9 = vcmask 261344   ;;  %vm2122_vm10 = vcmask 294144   ;;  %vm2230_vm11 = vcmask 293888  }
  0x1d   : > { %s2813_s22 = smov 20   ;;  %s2814_s23 = smov 24  }
  0x1e   : > { %s2629_s21 = sshll.u32 %s2923_s20, 8  ;;  %s2594_s25 = sshll.u32 %s2923_s20, 5 }
  0x1f   : > { %s2929_s24 = scalar_lea.vmem %s4142_s2, %s2629_s21  ;;  %s2812_s21 = smov 16  }
  0x20   : > { %v402_v0 = vld [vmem:[%s2929_s24 + $0x20] sm:$0xff]  ;;  %v399_v2 = vld [vmem:[%s2929_s24 + $0x8] sm:$0xff]  ;;  %p372_p12 = scmp.lt.s32.totalorder %s369_s19, 15  ;;  %v405_v4 = vld [vmem:[%s2929_s24 + $0x38] sm:$0xff]  ;;  %s2208_s29 = sld [smem:[#allocation6]] }
  0x21   : > { %v398_v1 = vld [vmem:[%s2929_s24] sm:$0xff]  ;;  %436 = vst.msk [vmem:[#allocation2 + $0x49] sm:$0xff] %vm431_vm0, %v402_v0  ;;  %v403_v3 = vld [vmem:[%s2929_s24 + $0x28] sm:$0xff]  ;;  %v400_v5 = vld [vmem:[%s2929_s24 + $0x10] sm:$0xff]  ;;  %s2817_s1 = smov -4.0   ;;  %s2632_s20 = sshll.u32 %s2798_s10, 8 }
  0x22   : > { %432 = vst.msk [vmem:[#allocation2 + $0x19] sm:$0xff] %vm431_vm0, %v398_v1  ;;  %s4203_s19 = smov (!%p372_p12, %s369_s19), 15  ;;  %v406_v6 = vld [vmem:[%s2929_s24 + $0x40] sm:$0xff]  ;;  %v408_v7 = vld [vmem:[%s2929_s24 + $0x50] sm:$0xff]  ;;  %v401_v8 = vld [vmem:[%s2929_s24 + $0x18] sm:$0xff] }
  0x23   : > { %433 = vst.msk [vmem:[#allocation2 + $0x21] sm:$0xff] %vm431_vm0, %v399_v2  ;;  %s2593_s26 = sshll.u32 %s4203_s19, 1  ;;  %v409_v10 = vld [vmem:[%s2929_s24 + $0x58] sm:$0xff]  ;;  %v411_v14 = vld [vmem:[%s2929_s24 + $0x68] sm:$0xff]  ;;  %v404_v15 = vld [vmem:[%s2929_s24 + $0x30] sm:$0xff]  ;;  %s2811_s19 = smov 12  }
  0x24   : > { %437 = vst.msk [vmem:[#allocation2 + $0x51] sm:$0xff] %vm431_vm0, %v403_v3  ;;  %s376_s27 = sadd.s32 %s2594_s25, %s2593_s26  ;;  %v412_v16 = vld [vmem:[%s2929_s24 + $0x70] sm:$0xff]  ;;  %v414_v20 = vld [vmem:[%s2929_s24 + $0x80] sm:$0xff]  ;;  %v407_v21 = vld [vmem:[%s2929_s24 + $0x48] sm:$0xff]  ;;  %s2816_s26 = smov 32  }
  0x25   : > { %439 = vst.msk [vmem:[#allocation2 + $0x69] sm:$0xff] %vm431_vm0, %v405_v4  ;;  %s2595_s28 = sshll.u32 %s376_s27, 3  ;;  %v415_v22 = vld [vmem:[%s2929_s24 + $0x88] sm:$0xff]  ;;  %v417_v26 = vld [vmem:[%s2929_s24 + $0x98] sm:$0xff]  ;;  %v410_v27 = vld [vmem:[%s2929_s24 + $0x60] sm:$0xff]  ;;  %s2596_s27 = sld [smem:[#allocation5 + $0x1]] }
  0x26   : > { %434 = vst.msk [vmem:[#allocation2 + $0x31] sm:$0xff] %vm431_vm0, %v400_v5  ;;  %s378_s12 = scalar_lea.vmem %s4143_s3, %s2595_s28  ;;  %v418_v28 = vld [vmem:[%s2929_s24 + $0xa0] sm:$0xff]  ;;  %v420_v32 = vld [vmem:[%s2929_s24 + $0xb0] sm:$0xff]  ;;  %v413_v33 = vld [vmem:[%s2929_s24 + $0x78] sm:$0xff] }
  0x27   : > { %440 = vst.msk [vmem:[#allocation2 + $0x79] sm:$0xff] %vm431_vm0, %v406_v6  ;;  %v464_v12 = vld [vmem:[%s378_s12] sm:$0xff]  ;;  %v465_v13 = vld [vmem:[%s378_s12 + $0x8] sm:$0xff]  ;;  %v421_v34 = vld [vmem:[%s2929_s24 + $0xb8] sm:$0xff]  ;;  %s2209_s12 = smax.f32 %s2817_s1, %s2208_s29  ;;  %s2455_s29 = scalar_lea.hbm %s4147_s7, %s2632_s20 }
  0x28   : > { %v616_v9 = vld [vmem:[#allocation2 + $0x49] sm:$0xff]  ;;  %442 = vst.msk [vmem:[#allocation2 + $0x91] sm:$0xff] %vm431_vm0, %v408_v7  ;;  %v426_v44 = vld [vmem:[%s2929_s24 + $0xe0] sm:$0xff]  ;;  %v425_v55 = vld [vmem:[%s2929_s24 + $0xd8] sm:$0xff] }
  0x29   : > { %686 = vrot.lane.b32.xlu0 %v616_v9, %s2809_s14  ;;  %v2956_v11 = vld [vmem:[#allocation2 + $0x19] sm:$0xff]  ;;  %435 = vst.msk [vmem:[#allocation2 + $0x39] sm:$0xff] %vm431_vm0, %v401_v8  ;;  %v423_v38 = vld [vmem:[%s2929_s24 + $0xc8] sm:$0xff]  ;;  %v416_v39 = vld [vmem:[%s2929_s24 + $0x90] sm:$0xff] }
  0x2a   : > { %678 = vrot.lane.b32.xlu1 %v2956_v11, %s2809_s14  ;;  %466 = vst.msk [vmem:[#allocation2 + $0x1] sm:$0xff] %vm431_vm0, %v464_v12  ;;  %v2973_v18 = vld [vmem:[#allocation2 + $0x21] sm:$0xff]  ;;  %v424_v40 = vld [vmem:[%s2929_s24 + $0xd0] sm:$0xff]  ;;  %v476_v3 = vld [vmem:[#allocation2 + $0x49] sm:$0x1] }
  0x2b   : > { %467 = vst.msk [vmem:[#allocation2 + $0x9] sm:$0xff] %vm431_vm0, %v465_v13  ;;  %v617_v25 = vld [vmem:[#allocation2 + $0x51] sm:$0xff]  ;;  %v419_v45 = vld [vmem:[%s2929_s24 + $0xa8] sm:$0xff]  ;;  %v422_v51 = vld [vmem:[%s2929_s24 + $0xc0] sm:$0xff]  ;;  %p386_p13 = scmp.lt.s32.totalorder %s2596_s27, 15 }
  0x2c   : > { %443 = vst.msk [vmem:[#allocation2 + $0x99] sm:$0xff] %vm431_vm0, %v409_v10  ;;  %v3001_v30 = vld [vmem:[#allocation2 + $0x69] sm:$0xff]  ;;  %v513_v60 = vld [vmem:[#allocation2 + $0x58] sm:$0x1]  ;;  %v511_v0 = vld [vmem:[#allocation2 + $0x28] sm:$0x1] }
  0x2d   : > { %v2967_v17 = vld [vmem:[#allocation2 + $0x31] sm:$0xff]  ;;  %445 = vst.msk [vmem:[#allocation2 + $0xb1] sm:$0xff] %vm431_vm0, %v411_v14  ;;  %v427_v46 = vld [vmem:[%s2929_s24 + $0xe8] sm:$0xff]  ;;  %v474_v9 = vld [vmem:[#allocation2 + $0x19] sm:$0x1]  ;;  %s4205_s27 = smov (!%p386_p13, %s2596_s27), 15 }
  0x2e   : > { %682 = vrot.lane.b32.xlu2 %v2967_v17, %s2809_s14  ;;  %438 = vst.msk [vmem:[#allocation2 + $0x61] sm:$0xff] %vm431_vm0, %v404_v15  ;;  %v620_v31 = vld [vmem:[#allocation2 + $0x79] sm:$0xff]  ;;  %v475_v8 = vld [vmem:[#allocation2 + $0x31] sm:$0x1]  ;;  %v514_v15 = vld [vmem:[#allocation2 + $0x70] sm:$0x1] }
  0x2f   : > { %446 = vst.msk [vmem:[#allocation2 + $0xc1] sm:$0xff] %vm431_vm0, %v412_v16  ;;  %v3016_v36 = vld [vmem:[#allocation2 + $0x91] sm:$0xff]  ;;  %v805_v14 = vld [vmem:[#allocation2 + $0x1a] sm:$0xff] }
  0x30   : > { %448 = vst.msk [vmem:[#allocation2 + $0xd9] sm:$0xff] %vm431_vm0, %v414_v20  ;;  %v2983_v23 = vld [vmem:[#allocation2 + $0x39] sm:$0xff] }
  0x31   : > { %v610_v19 = vld [vmem:[#allocation2 + $0x1] sm:$0xff]  ;;  %441 = vst.msk [vmem:[#allocation2 + $0x81] sm:$0xff] %vm431_vm0, %v407_v21  ;;  %v512_v56 = vld [vmem:[#allocation2 + $0x40] sm:$0x1] }
  0x32   : > { %674 = vrot.lane.b32.xlu0 %v610_v19, %s2809_s14  ;;  %680 = vrot.lane.b32.xlu1 %v2973_v18, %s2809_s14  ;;  %449 = vst.msk [vmem:[#allocation2 + $0xe1] sm:$0xff] %vm431_vm0, %v415_v22  ;;  %v611_v24 = vld [vmem:[#allocation2 + $0x9] sm:$0xff]  ;;  %v473_v12 = vld [vmem:[#allocation2 + $0x1] sm:$0x1]  ;;  %v3117_v22 = vld [vmem:[#allocation2 + $0x38] sm:$0xff] }
  0x33   : > { %451 = vst.msk [vmem:[#allocation2 + $0xf9] sm:$0xff] %vm431_vm0, %v417_v26  ;;  %v623_v37 = vld [vmem:[#allocation2 + $0x99] sm:$0xff]  ;;  %v510_v50 = vld [vmem:[#allocation2 + $0x10] sm:$0x1]  ;;  %v803_v7 = vld [vmem:[#allocation2 + $0x2] sm:$0xff] }
  0x34   : > { %444 = vst.msk [vmem:[#allocation2 + $0xa9] sm:$0xff] %vm431_vm0, %v410_v27  ;;  %v3031_v42 = vld [vmem:[#allocation2 + $0xb1] sm:$0xff]  ;;  %v516_v6 = vld [vmem:[#allocation2 + $0xa0] sm:$0x1] }
  0x35   : > { %v2995_v29 = vld [vmem:[#allocation2 + $0x61] sm:$0xff]  ;;  %452 = vst.msk [vmem:[#allocation2 + $0x109] sm:$0xff] %vm431_vm0, %v418_v28 }
  0x36   : > { %684 = vrot.lane.b32.xlu2 %v2983_v23, %s2809_s14  ;;  %454 = vst.msk [vmem:[#allocation2 + $0x121] sm:$0xff] %vm431_vm0, %v420_v32  ;;  %v626_v43 = vld [vmem:[#allocation2 + $0xc1] sm:$0xff] }
  0x37   : > { %447 = vst.msk [vmem:[#allocation2 + $0xc9] sm:$0xff] %vm431_vm0, %v413_v33  ;;  %v3046_v48 = vld [vmem:[#allocation2 + $0xd9] sm:$0xff]  ;;  %v3137_v33 = vld [vmem:[#allocation2 + $0x4a] sm:$0xff] }
  0x38   : > { %v3010_v35 = vld [vmem:[#allocation2 + $0x81] sm:$0xff]  ;;  %455 = vst.msk [vmem:[#allocation2 + $0x129] sm:$0xff] %vm431_vm0, %v421_v34 }
  0x39   : > { %457 = vst.msk [vmem:[#allocation2 + $0x141] sm:$0xff] %vm431_vm0, %v423_v38  ;;  %v629_v49 = vld [vmem:[#allocation2 + $0xe1] sm:$0xff] }
  0x3a   : > { %676 = vrot.lane.b32.xlu0 %v611_v24, %s2809_s14  ;;  %688 = vrot.lane.b32.xlu1 %v617_v25, %s2809_s14  ;;  %450 = vst.msk [vmem:[#allocation2 + $0xf1] sm:$0xff] %vm431_vm0, %v416_v39  ;;  %v3058_v53 = vld [vmem:[#allocation2 + $0xf9] sm:$0xff]  ;;  %v515_v1 = vld [vmem:[#allocation2 + $0x88] sm:$0x1]  ;;  %v477_v34 = vld [vmem:[#allocation2 + $0x61] sm:$0x1] }
  0x3b   : > { %v3025_v41 = vld [vmem:[#allocation2 + $0xa9] sm:$0xff]  ;;  %458 = vst.msk [vmem:[#allocation2 + $0x151] sm:$0xff] %vm431_vm0, %v424_v40  ;;  %v3124_v25 = vld [vmem:[#allocation2 + $0x32] sm:$0xff]  ;;  %v3127_v27 = vld [vmem:[#allocation2 + $0x20] sm:$0xff] }
  0x3c   : > { %460 = vst.msk [vmem:[#allocation2 + $0x169] sm:$0xff] %vm431_vm0, %v426_v44  ;;  %v632_v54 = vld [vmem:[#allocation2 + $0x109] sm:$0xff]  ;;  %v519_v32 = vld [vmem:[#allocation2 + $0xe8] sm:$0x1] }
  0x3d   : > { %453 = vst.msk [vmem:[#allocation2 + $0x111] sm:$0xff] %vm431_vm0, %v419_v45  ;;  %v3070_v58 = vld [vmem:[#allocation2 + $0x121] sm:$0xff] }
  0x3e   : > { %690 = vrot.lane.b32.xlu2 %v2995_v29, %s2809_s14  ;;  %v3040_v47 = vld [vmem:[#allocation2 + $0xc9] sm:$0xff]  ;;  %461 = vst.msk [vmem:[#allocation2 + $0x171] sm:$0xff] %vm431_vm0, %v427_v46 }
  0x3f   : > { %528 = vst.msk [vmem:[#allocation2 + $0x11] sm:$0x1] %vm491_vm1, %v510_v50  ;;  %v635_v59 = vld [vmem:[#allocation2 + $0x129] sm:$0xff] }
  0x40   : > { %456 = vst.msk [vmem:[#allocation2 + $0x139] sm:$0xff] %vm431_vm0, %v422_v51  ;;  %v3080_v62 = vld [vmem:[#allocation2 + $0x141] sm:$0xff]  ;;  %v518_v16 = vld [vmem:[#allocation2 + $0xd0] sm:$0x1] }
  0x41   : > { %v3053_v52 = vld [vmem:[#allocation2 + $0xf1] sm:$0xff]  ;;  %459 = vst.msk [vmem:[#allocation2 + $0x159] sm:$0xff] %vm431_vm0, %v425_v55  ;;  %v811_v39 = vld [vmem:[#allocation2 + $0x62] sm:$0xff]  ;;  %v3172_v55 = vld [vmem:[#allocation2 + $0x7a] sm:$0xff] }
  0x42   : > { %692 = vrot.lane.b32.xlu0 %v3001_v30, %s2809_s14  ;;  %694 = vrot.lane.b32.xlu1 %v620_v31, %s2809_s14  ;;  %530 = vst.msk [vmem:[#allocation2 + $0x41] sm:$0x1] %vm491_vm1, %v512_v56  ;;  %v638_v63 = vld [vmem:[#allocation2 + $0x151] sm:$0xff]  ;;  %v547_v31 = vld [vmem:[#allocation2 + $0x8] sm:$0xff]  ;;  %v3165_v51 = vld [vmem:[#allocation2 + $0x80] sm:$0xff] }
  0x43   : > { %531 = vst.msk [vmem:[#allocation2 + $0x59] sm:$0x1] %vm491_vm1, %v513_v60  ;;  %v3092_v4 = vld [vmem:[#allocation2 + $0x169] sm:$0xff] }
  0x44   : > { %v3065_v57 = vld [vmem:[#allocation2 + $0x111] sm:$0xff]  ;;  %529 = vst.msk [vmem:[#allocation2 + $0x29] sm:$0x1] %vm491_vm1, %v511_v0  ;;  %v3154_v44 = vld [vmem:[#allocation2 + $0x68] sm:$0xff]  ;;  %v522_v60 = vld [vmem:[#allocation2 + $0x130] sm:$0x1] }
  0x45   : > { %533 = vst.msk [vmem:[#allocation2 + $0x89] sm:$0x1] %vm491_vm1, %v515_v1  ;;  %v641_v5 = vld [vmem:[#allocation2 + $0x171] sm:$0xff] }
  0x46   : > { %696 = vrot.lane.b32.xlu2 %v3010_v35, %s2809_s14  ;;  %495 = vst.msk [vmem:[#allocation2 + $0x48] sm:$0x1] %vm491_vm1, %v476_v3  ;;  %v804_v13 = vld [vmem:[#allocation2 + $0xa] sm:$0xff]  ;;  %v521_v50 = vld [vmem:[#allocation2 + $0x118] sm:$0x1] }
  0x47   : > { %v3076_v61 = vld [vmem:[#allocation2 + $0x139] sm:$0xff]  ;;  %534 = vst.msk [vmem:[#allocation2 + $0xa1] sm:$0x1] %vm491_vm1, %v516_v6 }
  0x48   : > { %v3085_v2 = vld [vmem:[#allocation2 + $0x159] sm:$0xff]  ;;  %494 = vst.msk [vmem:[#allocation2 + $0x30] sm:$0x1] %vm491_vm1, %v475_v8 }
  0x49   : > { %493 = vst.msk [vmem:[#allocation2 + $0x18] sm:$0x1] %vm491_vm1, %v474_v9  ;;  %v808_v26 = vld [vmem:[#allocation2 + $0x3a] sm:$0xff]  ;;  %v3181_v0 = vld [vmem:[#allocation2 + $0x92] sm:$0xff] }
  0x4a   : > { %698 = vrot.lane.b32.xlu0 %v3016_v36, %s2809_s14  ;;  %700 = vrot.lane.b32.xlu1 %v623_v37, %s2809_s14  ;;  %492 = vst.msk [vmem:[#allocation2] sm:$0x1] %vm491_vm1, %v473_v12  ;;  %v3141_v37 = vld [vmem:[#allocation2 + $0x50] sm:$0xff]  ;;  %v3196_v9 = vld [vmem:[#allocation2 + $0x98] sm:$0xff] }
  0x4b   : > { %v3108_v19 = vld [vmem:[#allocation2 + $0x22] sm:$0xff]  ;;  %532 = vst.msk [vmem:[#allocation2 + $0x71] sm:$0x1] %vm491_vm1, %v514_v15  ;;  %v3148_v38 = vld [vmem:[#allocation2 + $0x52] sm:$0xff]  ;;  %v481_v15 = vld [vmem:[#allocation2 + $0xc1] sm:$0x1] }
  0x4c   : > { %536 = vst.msk [vmem:[#allocation2 + $0xd1] sm:$0x1] %vm491_vm1, %v518_v16  ;;  %v814_v56 = vld [vmem:[#allocation2 + $0x82] sm:$0xff] }
  0x4d   : > { %v3098_v10 = vld [vmem:[#allocation2 + $0x48] sm:$0xff]  ;;  %583 = vst.msk [vmem:[#allocation3 + $0x28] sm:$0xff] %vm431_vm0, %v3117_v22 }
  0x4e   : > { %702 = vrot.lane.b32.xlu2 %v3025_v41, %s2809_s14  ;;  %584 = vst.msk [vmem:[#allocation3 + $0x30] sm:$0xff] %vm431_vm0, %v3098_v10  ;;  %v3187_v6 = vld [vmem:[#allocation2 + $0x9a] sm:$0xff] }
  0x4f   : > { %v3110_v20 = vld [vmem:[#allocation2 + $0x30] sm:$0xff]  ;;  %581 = vst.msk [vmem:[#allocation3 + $0x18] sm:$0xff] %vm431_vm0, %v3127_v27 }
  0x50   : > { %582 = vst.msk [vmem:[#allocation3 + $0x20] sm:$0xff] %vm431_vm0, %v3110_v20  ;;  %v3115_v21 = vld [vmem:[#allocation2 + $0x18] sm:$0xff] }
  0x51   : > { %580 = vst.msk [vmem:[#allocation3 + $0x10] sm:$0xff] %vm431_vm0, %v3115_v21  ;;  %v546_v24 = vld [vmem:[#allocation2] sm:$0xff] }
  0x52   : > { %704 = vrot.lane.b32.xlu0 %v3031_v42, %s2809_s14  ;;  %706 = vrot.lane.b32.xlu1 %v626_v43, %s2809_s14  ;;  %578 = vst.msk [vmem:[#allocation3] sm:$0xff] %vm431_vm0, %v546_v24  ;;  %v517_v43 = vld [vmem:[#allocation2 + $0xb8] sm:$0x1]  ;;  %v3157_v45 = vld [vmem:[#allocation2 + $0x6a] sm:$0xff] }
  0x53   : > { %579 = vst.msk [vmem:[#allocation3 + $0x8] sm:$0xff] %vm431_vm0, %v547_v31  ;;  %v3221_v31 = vld [vmem:[#allocation2 + $0xc2] sm:$0xff] }
  0x54   : > { %496 = vst.msk [vmem:[#allocation2 + $0x60] sm:$0x1] %vm491_vm1, %v477_v34  ;;  %v520_v34 = vld [vmem:[#allocation2 + $0x100] sm:$0x1] }
  0x55   : > { %537 = vst.msk [vmem:[#allocation2 + $0xe9] sm:$0x1] %vm491_vm1, %v519_v32  ;;  %v3223_v32 = vld [vmem:[#allocation2 + $0xca] sm:$0xff] }
  0x56   : > { %708 = vrot.lane.b32.xlu2 %v3040_v47, %s2809_s14  ;;  %585 = vst.msk [vmem:[#allocation3 + $0x38] sm:$0xff] %vm431_vm0, %v3141_v37 }
  0x57   : > { %535 = vst.msk [vmem:[#allocation2 + $0xb9] sm:$0x1] %vm491_vm1, %v517_v43  ;;  %v3235_v43 = vld [vmem:[#allocation2 + $0xda] sm:$0xff] }
  0x58   : > { %587 = vst.msk [vmem:[#allocation3 + $0x48] sm:$0xff] %vm431_vm0, %v3154_v44 }
  0x59   : > { %589 = vst.msk [vmem:[#allocation3 + $0x58] sm:$0xff] %vm431_vm0, %v3165_v51 }
  0x5a   : > { %710 = vrot.lane.b32.xlu0 %v3046_v48, %s2809_s14  ;;  %712 = vrot.lane.b32.xlu1 %v629_v49, %s2809_s14  ;;  %v478_v49 = vld [vmem:[#allocation2 + $0x79] sm:$0x1]  ;;  %539 = vst.msk [vmem:[#allocation2 + $0x119] sm:$0x1] %vm491_vm1, %v521_v50 }
  0x5b   : > { %v3159_v46 = vld [vmem:[#allocation2 + $0x60] sm:$0xff]  ;;  %497 = vst.msk [vmem:[#allocation2 + $0x78] sm:$0x1] %vm491_vm1, %v478_v49 }
  0x5c   : > { %586 = vst.msk [vmem:[#allocation3 + $0x40] sm:$0xff] %vm431_vm0, %v3159_v46 }
  0x5d   : > { %540 = vst.msk [vmem:[#allocation2 + $0x131] sm:$0x1] %vm491_vm1, %v522_v60  ;;  %v3246_v60 = vld [vmem:[#allocation2 + $0xe2] sm:$0xff] }
  0x5e   : > { %714 = vrot.lane.b32.xlu2 %v3053_v52, %s2809_s14  ;;  %591 = vst.msk [vmem:[#allocation3 + $0x68] sm:$0xff] %vm431_vm0, %v3196_v9 }
  0x5f   : > { %500 = vst.msk [vmem:[#allocation2 + $0xc0] sm:$0x1] %vm491_vm1, %v481_v15 }
  0x60   : > { %4165 = vst [vmem:[#allocation11_spill] sm:$0xff] %v3221_v31 }
  0x61   : > { %4166 = vst [vmem:[#allocation12_spill] sm:$0xff] %v3223_v32 }
  0x62   : > { %716 = vrot.lane.b32.xlu0 %v3058_v53, %s2809_s14  ;;  %718 = vrot.lane.b32.xlu1 %v632_v54, %s2809_s14  ;;  %v479_v54 = vld [vmem:[#allocation2 + $0x91] sm:$0x1]  ;;  %v3184_v3 = vld [vmem:[#allocation2 + $0x78] sm:$0xff]  ;;  %538 = vst.msk [vmem:[#allocation2 + $0x101] sm:$0x1] %vm491_vm1, %v520_v34 }
  0x63   : > { %498 = vst.msk [vmem:[#allocation2 + $0x90] sm:$0x1] %vm491_vm1, %v479_v54  ;;  %v3270_v34 = vld [vmem:[#allocation2 + $0x10a] sm:$0xff] }
  0x64   : > { %588 = vst.msk [vmem:[#allocation3 + $0x50] sm:$0xff] %vm431_vm0, %v3184_v3 }
  0x65   : > { %4167 = vst [vmem:[#allocation13_spill] sm:$0xff] %v3235_v43 }
  0x66   : > { %720 = vrot.lane.b32.xlu2 %v3065_v57, %s2809_s14  ;;  %v3237_v49 = vld [vmem:[#allocation2 + $0xc0] sm:$0xff]  ;;  %4168 = vst [vmem:[#allocation14_spill] sm:$0xff] %v3246_v60 }
  0x67   : > { %594 = vst.msk [vmem:[#allocation3 + $0x80] sm:$0xff] %vm431_vm0, %v3237_v49 }
  0x68   : > { %4171 = vst [vmem:[#allocation17_spill] sm:$0xff] %v3270_v34 }
  0x69   : > { %v3263_v15 = vld [vmem:[#allocation2 + $0xfa] sm:$0xff] }
  0x6a   : > { %722 = vrot.lane.b32.xlu0 %v3070_v58, %s2809_s14  ;;  %724 = vrot.lane.b32.xlu1 %v635_v59, %s2809_s14  ;;  %v3193_v8 = vld [vmem:[#allocation2 + $0x90] sm:$0xff]  ;;  %4170 = vst [vmem:[#allocation16_spill] sm:$0xff] %v3263_v15 }
  0x6b   : > { %590 = vst.msk [vmem:[#allocation3 + $0x60] sm:$0xff] %vm431_vm0, %v3193_v8 }
  0x6e   : > { %726 = vrot.lane.b32.xlu2 %v3076_v61, %s2809_s14 }
  0x72   : > { %728 = vrot.lane.b32.xlu0 %v3080_v62, %s2809_s14  ;;  %730 = vrot.lane.b32.xlu1 %v638_v63, %s2809_s14 }
  0x76   : > { %732 = vrot.lane.b32.xlu2 %v3085_v2, %s2809_s14 }
  0x7a   : > { %734 = vrot.lane.b32.xlu0 %v3092_v4, %s2809_s14  ;;  %736 = vrot.lane.b32.xlu1 %v641_v5, %s2809_s14  ;;  %v480_v5 = vld [vmem:[#allocation2 + $0xa9] sm:$0x1]  ;;  %s2597_s14 = sshll.u32 %s4205_s27, 1 }
  0x7b   : > { %499 = vst.msk [vmem:[#allocation2 + $0xa8] sm:$0x1] %vm491_vm1, %v480_v5 }
  0x7e   : > { %867 = vrot.lane.b32.xlu2 %v803_v7, %s2810_s16  ;;  %v817_v7 = vld [vmem:[#allocation2 + $0xaa] sm:$0xff] }
  0x82   : > { %869 = vrot.lane.b32.xlu0 %v804_v13, %s2810_s16  ;;  %871 = vrot.lane.b32.xlu1 %v805_v14, %s2810_s16  ;;  %v3206_v13 = vld [vmem:[#allocation2 + $0xb0] sm:$0xff] }
  0x83   : > { %v3208_v14 = vld [vmem:[#allocation2 + $0xb2] sm:$0xff]  ;;  %593 = vst.msk [vmem:[#allocation3 + $0x78] sm:$0xff] %vm431_vm0, %v3206_v13 }
  0x86   : > { %873 = vrot.lane.b32.xlu2 %v3108_v19, %s2810_s16 }
  0x88   : > { %v683_v28 = vpop.permute.xlu2 %682 }
  0x89   : > { %775 = vst.msk [vmem:[#allocation3 + $0x20] sm:$0xff] %vm770_vm2, %v683_v28  ;;  %v3219_v28 = vld [vmem:[#allocation2 + $0xa8] sm:$0xff] }
  0x8a   : > { %875 = vrot.lane.b32.xlu0 %v3124_v25, %s2810_s16  ;;  %877 = vrot.lane.b32.xlu1 %v808_v26, %s2810_s16  ;;  %v3214_v26 = vld [vmem:[#allocation2 + $0xc8] sm:$0xff]  ;;  %592 = vst.msk [vmem:[#allocation3 + $0x70] sm:$0xff] %vm431_vm0, %v3219_v28 }
  0x8b   : > { %595 = vst.msk [vmem:[#allocation3 + $0x88] sm:$0xff] %vm431_vm0, %v3214_v26 }
  0x8e   : > { %879 = vrot.lane.b32.xlu2 %v3137_v33, %s2810_s16 }
  0x90   : > { %v685_v40 = vpop.permute.xlu2 %684 }
  0x91   : > { %776 = vst.msk [vmem:[#allocation3 + $0x28] sm:$0xff] %vm770_vm2, %v685_v40  ;;  %v524_v40 = vld [vmem:[#allocation2 + $0x160] sm:$0x1] }
  0x92   : > { %881 = vrot.lane.b32.xlu0 %v3148_v38, %s2810_s16  ;;  %883 = vrot.lane.b32.xlu1 %v811_v39, %s2810_s16  ;;  %542 = vst.msk [vmem:[#allocation2 + $0x161] sm:$0x1] %vm491_vm1, %v524_v40  ;;  %v3276_v40 = vld [vmem:[#allocation2 + $0x112] sm:$0xff] }
  0x93   : > { %4172 = vst [vmem:[#allocation18_spill] sm:$0xff] %v3276_v40 }
  0x96   : > { %885 = vrot.lane.b32.xlu2 %v3157_v45, %s2810_s16 }
  0x98   : > { %v691_v59 = vpop.permute.xlu2 %690 }
  0x99   : > { %779 = vst.msk [vmem:[#allocation3 + $0x40] sm:$0xff] %vm770_vm2, %v691_v59  ;;  %v483_v59 = vld [vmem:[#allocation2 + $0xf1] sm:$0x1] }
  0x9a   : > { %887 = vrot.lane.b32.xlu0 %v3172_v55, %s2810_s16  ;;  %889 = vrot.lane.b32.xlu1 %v814_v56, %s2810_s16  ;;  %v482_v56 = vld [vmem:[#allocation2 + $0xd9] sm:$0x1]  ;;  %502 = vst.msk [vmem:[#allocation2 + $0xf0] sm:$0x1] %vm491_vm1, %v483_v59  ;;  %v484_v59 = vld [vmem:[#allocation2 + $0x109] sm:$0x1] }
  0x9b   : > { %v687_v63 = vpop.permute.xlu0 %686  ;;  %501 = vst.msk [vmem:[#allocation2 + $0xd8] sm:$0x1] %vm491_vm1, %v482_v56 }
  0x9c   : > { %777 = vst.msk [vmem:[#allocation3 + $0x30] sm:$0xff] %vm770_vm2, %v687_v63  ;;  %v679_v1 = vpop.permute.xlu1 %678  ;;  %v3248_v63 = vld [vmem:[#allocation2 + $0xf2] sm:$0xff] }
  0x9d   : > { %773 = vst.msk [vmem:[#allocation3 + $0x10] sm:$0xff] %vm770_vm2, %v679_v1  ;;  %v3251_v1 = vld [vmem:[#allocation2 + $0xe0] sm:$0xff] }
  0x9e   : > { %891 = vrot.lane.b32.xlu2 %v3181_v0, %s2810_s16  ;;  %4169 = vst [vmem:[#allocation15_spill] sm:$0xff] %v3248_v63 }
  0x9f   : > { %597 = vst.msk [vmem:[#allocation3 + $0x98] sm:$0xff] %vm431_vm0, %v3251_v1 }
  0xa0   : > { %v697_v12 = vpop.permute.xlu2 %696  ;;  %503 = vst.msk [vmem:[#allocation2 + $0x108] sm:$0x1] %vm491_vm1, %v484_v59  ;;  %v3306_v59 = vld [vmem:[#allocation2 + $0x128] sm:$0xff] }
  0xa1   : > { %782 = vst.msk [vmem:[#allocation3 + $0x58] sm:$0xff] %vm770_vm2, %v697_v12  ;;  %v3261_v12 = vld [vmem:[#allocation2 + $0xf8] sm:$0xff] }
  0xa2   : > { %893 = vrot.lane.b32.xlu0 %v3187_v6, %s2810_s16  ;;  %895 = vrot.lane.b32.xlu1 %v817_v7, %s2810_s16  ;;  %v525_v7 = vld [vmem:[#allocation2 + $0x178] sm:$0x1]  ;;  %599 = vst.msk [vmem:[#allocation3 + $0xa8] sm:$0xff] %vm431_vm0, %v3261_v12 }
  0xa3   : > { %543 = vst.msk [vmem:[#allocation2 + $0x179] sm:$0x1] %vm491_vm1, %v525_v7  ;;  %v3293_v7 = vld [vmem:[#allocation2 + $0x122] sm:$0xff] }
  0xa4   : > { %v675_v16 = vpop.permute.xlu0 %674  ;;  %v681_v24 = vpop.permute.xlu1 %680  ;;  %4173 = vst [vmem:[#allocation19_spill] sm:$0xff] %v3293_v7 }
  0xa5   : > { %771 = vst.msk [vmem:[#allocation3] sm:$0xff] %vm770_vm2, %v675_v16 }
  0xa6   : > { %774 = vst.msk [vmem:[#allocation3 + $0x18] sm:$0xff] %vm770_vm2, %v681_v24  ;;  %897 = vrot.lane.b32.xlu2 %v3208_v14, %s2810_s16 }
  0xa7   : > { %603 = vst.msk [vmem:[#allocation3 + $0xc8] sm:$0xff] %vm431_vm0, %v3306_v59 }
  0xa8   : > { %v703_v39 = vpop.permute.xlu2 %702 }
  0xa9   : > { %785 = vst.msk [vmem:[#allocation3 + $0x70] sm:$0xff] %vm770_vm2, %v703_v39  ;;  %v3274_v39 = vld [vmem:[#allocation2 + $0xd8] sm:$0xff] }
  0xaa   : > { %899 = vrot.lane.b32.xlu0 %v3221_v31, %s2810_s16  ;;  %901 = vrot.lane.b32.xlu1 %v3223_v32, %s2810_s16  ;;  %596 = vst.msk [vmem:[#allocation3 + $0x90] sm:$0xff] %vm431_vm0, %v3274_v39 }
  0xac   : > { %v677_v50 = vpop.permute.xlu0 %676  ;;  %v689_v54 = vpop.permute.xlu1 %688 }
  0xad   : > { %772 = vst.msk [vmem:[#allocation3 + $0x8] sm:$0xff] %vm770_vm2, %v677_v50  ;;  %v3280_v50 = vld [vmem:[#allocation2 + $0xf0] sm:$0xff] }
  0xae   : > { %778 = vst.msk [vmem:[#allocation3 + $0x38] sm:$0xff] %vm770_vm2, %v689_v54  ;;  %903 = vrot.lane.b32.xlu2 %v3235_v43, %s2810_s16  ;;  %v3282_v54 = vld [vmem:[#allocation2 + $0x110] sm:$0xff]  ;;  %v488_v43 = vld [vmem:[#allocation2 + $0x169] sm:$0x1] }
  0xaf   : > { %598 = vst.msk [vmem:[#allocation3 + $0xa0] sm:$0xff] %vm431_vm0, %v3280_v50 }
  0xb0   : > { %v709_v5 = vpop.permute.xlu2 %708  ;;  %601 = vst.msk [vmem:[#allocation3 + $0xb8] sm:$0xff] %vm431_vm0, %v3282_v54 }
  0xb1   : > { %788 = vst.msk [vmem:[#allocation3 + $0x88] sm:$0xff] %vm770_vm2, %v709_v5  ;;  %v523_v5 = vld [vmem:[#allocation2 + $0x148] sm:$0x1] }
  0xb2   : > { %905 = vrot.lane.b32.xlu0 %v3246_v60, %s2810_s16  ;;  %907 = vrot.lane.b32.xlu1 %v3248_v63, %s2810_s16  ;;  %541 = vst.msk [vmem:[#allocation2 + $0x149] sm:$0x1] %vm491_vm1, %v523_v5  ;;  %v3314_v5 = vld [vmem:[#allocation2 + $0x108] sm:$0xff]  ;;  %v3340_v60 = vld [vmem:[#allocation2 + $0x158] sm:$0xff] }
  0xb3   : > { %600 = vst.msk [vmem:[#allocation3 + $0xb0] sm:$0xff] %vm431_vm0, %v3314_v5 }
  0xb4   : > { %v693_v16 = vpop.permute.xlu0 %692  ;;  %v695_v24 = vpop.permute.xlu1 %694  ;;  %607 = vst.msk [vmem:[#allocation3 + $0xe8] sm:$0xff] %vm431_vm0, %v3340_v60 }
  0xb5   : > { %780 = vst.msk [vmem:[#allocation3 + $0x48] sm:$0xff] %vm770_vm2, %v693_v16 }
  0xb6   : > { %781 = vst.msk [vmem:[#allocation3 + $0x50] sm:$0xff] %vm770_vm2, %v695_v24  ;;  %909 = vrot.lane.b32.xlu2 %v3263_v15, %s2810_s16  ;;  %v485_v15 = vld [vmem:[#allocation2 + $0x121] sm:$0x1] }
  0xb7   : > { %504 = vst.msk [vmem:[#allocation2 + $0x120] sm:$0x1] %vm491_vm1, %v485_v15 }
  0xb8   : > { %v715_v56 = vpop.permute.xlu2 %714  ;;  %507 = vst.msk [vmem:[#allocation2 + $0x168] sm:$0x1] %vm491_vm1, %v488_v43 }
  0xb9   : > { %791 = vst.msk [vmem:[#allocation3 + $0xa0] sm:$0xff] %vm770_vm2, %v715_v56  ;;  %v486_v56 = vld [vmem:[#allocation2 + $0x139] sm:$0x1]  ;;  %v3322_v15 = vld [vmem:[#allocation2 + $0x142] sm:$0xff] }
  0xba   : > { %911 = vrot.lane.b32.xlu0 %v3270_v34, %s2810_s16  ;;  %913 = vrot.lane.b32.xlu1 %v3276_v40, %s2810_s16  ;;  %v3301_v40 = vld [vmem:[#allocation2 + $0x12a] sm:$0xff]  ;;  %v3303_v34 = vld [vmem:[#allocation2 + $0x13a] sm:$0xff]  ;;  %505 = vst.msk [vmem:[#allocation2 + $0x138] sm:$0x1] %vm491_vm1, %v486_v56  ;;  %v3328_v56 = vld [vmem:[#allocation2 + $0x152] sm:$0xff] }
  0xbb   : > { %4174 = vst [vmem:[#allocation20_spill] sm:$0xff] %v3301_v40 }
  0xbc   : > { %v699_v16 = vpop.permute.xlu0 %698  ;;  %v701_v24 = vpop.permute.xlu1 %700  ;;  %4175 = vst [vmem:[#allocation21_spill] sm:$0xff] %v3303_v34 }
  0xbd   : > { %783 = vst.msk [vmem:[#allocation3 + $0x60] sm:$0xff] %vm770_vm2, %v699_v16  ;;  %v3318_v16 = vld [vmem:[#allocation2 + $0x140] sm:$0xff] }
  0xbe   : > { %784 = vst.msk [vmem:[#allocation3 + $0x68] sm:$0xff] %vm770_vm2, %v701_v24  ;;  %915 = vrot.lane.b32.xlu2 %v3293_v7, %s2810_s16 }
  0xbf   : > { %4176 = vst [vmem:[#allocation22_spill] sm:$0xff] %v3322_v15 }
  0xc0   : > { %v721_v63 = vpop.permute.xlu2 %720  ;;  %605 = vst.msk [vmem:[#allocation3 + $0xd8] sm:$0xff] %vm431_vm0, %v3318_v16 }
  0xc1   : > { %794 = vst.msk [vmem:[#allocation3 + $0xb8] sm:$0xff] %vm770_vm2, %v721_v63  ;;  %v3338_v7 = vld [vmem:[#allocation2 + $0x138] sm:$0xff] }
  0xc2   : > { %917 = vrot.lane.b32.xlu0 %v3301_v40, %s2810_s16  ;;  %919 = vrot.lane.b32.xlu1 %v3303_v34, %s2810_s16  ;;  %4177 = vst [vmem:[#allocation23_spill] sm:$0xff] %v3328_v56  ;;  %v3332_v34 = vld [vmem:[#allocation2 + $0x120] sm:$0xff] }
  0xc3   : > { %v3334_v40 = vld [vmem:[#allocation2 + $0x15a] sm:$0xff]  ;;  %602 = vst.msk [vmem:[#allocation3 + $0xc0] sm:$0xff] %vm431_vm0, %v3332_v34 }
  0xc4   : > { %v705_v24 = vpop.permute.xlu0 %704  ;;  %v707_v63 = vpop.permute.xlu1 %706  ;;  %4178 = vst [vmem:[#allocation24_spill] sm:$0xff] %v3334_v40 }
  0xc5   : > { %786 = vst.msk [vmem:[#allocation3 + $0x78] sm:$0xff] %vm770_vm2, %v705_v24 }
  0xc6   : > { %787 = vst.msk [vmem:[#allocation3 + $0x80] sm:$0xff] %vm770_vm2, %v707_v63  ;;  %921 = vrot.lane.b32.xlu2 %v3322_v15, %s2810_s16  ;;  %v487_v63 = vld [vmem:[#allocation2 + $0x151] sm:$0x1] }
  0xc7   : > { %604 = vst.msk [vmem:[#allocation3 + $0xd0] sm:$0xff] %vm431_vm0, %v3338_v7  ;;  %v3351_v15 = vld [vmem:[#allocation2 + $0x16a] sm:$0xff] }
  0xc8   : > { %v727_v24 = vpop.permute.xlu2 %726  ;;  %506 = vst.msk [vmem:[#allocation2 + $0x150] sm:$0x1] %vm491_vm1, %v487_v63 }
  0xc9   : > { %797 = vst.msk [vmem:[#allocation3 + $0xd0] sm:$0xff] %vm770_vm2, %v727_v24  ;;  %v3356_v24 = vld [vmem:[#allocation2 + $0x170] sm:$0xff] }
  0xca   : > { %923 = vrot.lane.b32.xlu0 %v3328_v56, %s2810_s16  ;;  %925 = vrot.lane.b32.xlu1 %v3334_v40, %s2810_s16  ;;  %v3361_v40 = vld [vmem:[#allocation2 + $0x172] sm:$0xff]  ;;  %609 = vst.msk [vmem:[#allocation3 + $0xf8] sm:$0xff] %vm431_vm0, %v3356_v24 }
  0xcb   : > { %4179 = vst [vmem:[#allocation25_spill] sm:$0xff] %v3361_v40 }
  0xcc   : > { %v711_v32 = vpop.permute.xlu0 %710  ;;  %v713_v31 = vpop.permute.xlu1 %712 }
  0xcd   : > { %789 = vst.msk [vmem:[#allocation3 + $0x90] sm:$0xff] %vm770_vm2, %v711_v32 }
  0xce   : > { %790 = vst.msk [vmem:[#allocation3 + $0x98] sm:$0xff] %vm770_vm2, %v713_v31  ;;  %927 = vrot.lane.b32.xlu2 %v3351_v15, %s2810_s16  ;;  %v3374_v31 = vld [vmem:[#allocation2 + $0x168] sm:$0xff] }
  0xcf   : > { %v3370_v32 = vld [vmem:[#allocation2 + $0x150] sm:$0xff]  ;;  %608 = vst.msk [vmem:[#allocation3 + $0xf0] sm:$0xff] %vm431_vm0, %v3374_v31 }
  0xd0   : > { %v733_v56 = vpop.permute.xlu2 %732  ;;  %606 = vst.msk [vmem:[#allocation3 + $0xe0] sm:$0xff] %vm431_vm0, %v3370_v32 }
  0xd1   : > { %800 = vst.msk [vmem:[#allocation3 + $0xe8] sm:$0xff] %vm770_vm2, %v733_v56 }
  0xd2   : > { %929 = vrot.lane.b32.xlu0 %v3361_v40, %s2810_s16  ;;  %1060 = vrot.lane.b32.xlu1 %v3115_v21, %s2811_s19 }
  0xd4   : > { %v717_v43 = vpop.permute.xlu0 %716  ;;  %v719_v63 = vpop.permute.xlu1 %718 }
  0xd5   : > { %792 = vst.msk [vmem:[#allocation3 + $0xa8] sm:$0xff] %vm770_vm2, %v717_v43 }
  0xd6   : > { %793 = vst.msk [vmem:[#allocation3 + $0xb0] sm:$0xff] %vm770_vm2, %v719_v63  ;;  %1062 = vrot.lane.b32.xlu2 %v3127_v27, %s2811_s19 }
  0xd8   : > { %v868_v21 = vpop.permute.xlu2 %867 }
  0xd9   : > { %964 = vst.msk [vmem:[#allocation3] sm:$0xff] %vm963_vm3, %v868_v21 }
  0xda   : > { %1064 = vrot.lane.b32.xlu0 %v3110_v20, %s2811_s19  ;;  %1066 = vrot.lane.b32.xlu1 %v3117_v22, %s2811_s19 }
  0xdc   : > { %v723_v56 = vpop.permute.xlu0 %722  ;;  %v725_v40 = vpop.permute.xlu1 %724 }
  0xdd   : > { %795 = vst.msk [vmem:[#allocation3 + $0xc0] sm:$0xff] %vm770_vm2, %v723_v56 }
  0xde   : > { %796 = vst.msk [vmem:[#allocation3 + $0xc8] sm:$0xff] %vm770_vm2, %v725_v40  ;;  %1068 = vrot.lane.b32.xlu2 %v3098_v10, %s2811_s19 }
  0xe0   : > { %v874_v27 = vpop.permute.xlu2 %873 }
  0xe1   : > { %967 = vst.msk [vmem:[#allocation3 + $0x18] sm:$0xff] %vm963_vm3, %v874_v27 }
  0xe2   : > { %1070 = vrot.lane.b32.xlu0 %v3141_v37, %s2811_s19  ;;  %1072 = vrot.lane.b32.xlu1 %v3159_v46, %s2811_s19 }
  0xe4   : > { %v729_v20 = vpop.permute.xlu0 %728  ;;  %v731_v22 = vpop.permute.xlu1 %730 }
  0xe5   : > { %798 = vst.msk [vmem:[#allocation3 + $0xd8] sm:$0xff] %vm770_vm2, %v729_v20 }
  0xe6   : > { %799 = vst.msk [vmem:[#allocation3 + $0xe0] sm:$0xff] %vm770_vm2, %v731_v22  ;;  %1074 = vrot.lane.b32.xlu2 %v3154_v44, %s2811_s19  ;;  %v428_v44 = vld [vmem:[%s2929_s24 + $0xf0] sm:$0xff] }
  0xe7   : > { %462 = vst.msk [vmem:[#allocation2 + $0x181] sm:$0xff] %vm431_vm0, %v428_v44 }
  0xe8   : > { %v880_v10 = vpop.permute.xlu2 %879 }
  0xe9   : > { %970 = vst.msk [vmem:[#allocation3 + $0x30] sm:$0xff] %vm963_vm3, %v880_v10 }
  0xea   : > { %1076 = vrot.lane.b32.xlu0 %v3184_v3, %s2811_s19  ;;  %1078 = vrot.lane.b32.xlu1 %v3165_v51, %s2811_s19 }
  0xec   : > { %v735_v37 = vpop.permute.xlu0 %734  ;;  %v737_v46 = vpop.permute.xlu1 %736 }
  0xed   : > { %801 = vst.msk [vmem:[#allocation3 + $0xf0] sm:$0xff] %vm770_vm2, %v735_v37 }
  0xee   : > { %802 = vst.msk [vmem:[#allocation3 + $0xf8] sm:$0xff] %vm770_vm2, %v737_v46  ;;  %1080 = vrot.lane.b32.xlu2 %v3193_v8, %s2811_s19  ;;  %v489_v43 = vld [vmem:[#allocation2 + $0x181] sm:$0x1] }
  0xef   : > { %508 = vst.msk [vmem:[#allocation2 + $0x180] sm:$0x1] %vm491_vm1, %v489_v43 }
  0xf0   : > { %v886_v40 = vpop.permute.xlu2 %885 }
  0xf1   : > { %973 = vst.msk [vmem:[#allocation3 + $0x48] sm:$0xff] %vm963_vm3, %v886_v40  ;;  %v3490_v40 = vld [vmem:[#allocation2 + $0x49] sm:$0xff] }
  0xf2   : > { %1082 = vrot.lane.b32.xlu0 %v3196_v9, %s2811_s19  ;;  %1084 = vrot.lane.b32.xlu1 %v3219_v28, %s2811_s19 }
  0xf4   : > { %v870_v51 = vpop.permute.xlu0 %869  ;;  %v872_v3 = vpop.permute.xlu1 %871 }
  0xf5   : > { %965 = vst.msk [vmem:[#allocation3 + $0x8] sm:$0xff] %vm963_vm3, %v870_v51 }
  0xf6   : > { %966 = vst.msk [vmem:[#allocation3 + $0x10] sm:$0xff] %vm963_vm3, %v872_v3  ;;  %1086 = vrot.lane.b32.xlu2 %v3206_v13, %s2811_s19  ;;  %v3468_v27 = vld [vmem:[#allocation2 + $0x180] sm:$0xff] }
  0xf8   : > { %v892_v8 = vpop.permute.xlu2 %891 }
  0xf9   : > { %976 = vst.msk [vmem:[#allocation3 + $0x60] sm:$0xff] %vm963_vm3, %v892_v8 }
  0xfa   : > { %1088 = vrot.lane.b32.xlu0 %v3237_v49, %s2811_s19  ;;  %1090 = vrot.lane.b32.xlu1 %v3214_v26, %s2811_s19 }
  0xfc   : > { %v876_v9 = vpop.permute.xlu0 %875  ;;  %v878_v28 = vpop.permute.xlu1 %877 }
  0xfd   : > { %968 = vst.msk [vmem:[#allocation3 + $0x20] sm:$0xff] %vm963_vm3, %v876_v9 }
  0xfe   : > { %969 = vst.msk [vmem:[#allocation3 + $0x28] sm:$0xff] %vm963_vm3, %v878_v28  ;;  %1092 = vrot.lane.b32.xlu2 %v3274_v39, %s2811_s19 }
 0x100   : > { %v898_v13 = vpop.permute.xlu2 %897 }
 0x101   : > { %979 = vst.msk [vmem:[#allocation3 + $0x78] sm:$0xff] %vm963_vm3, %v898_v13 }
 0x102   : > { %1094 = vrot.lane.b32.xlu0 %v3251_v1, %s2811_s19  ;;  %1096 = vrot.lane.b32.xlu1 %v3280_v50, %s2811_s19 }
 0x104   : > { %v882_v26 = vpop.permute.xlu0 %881  ;;  %v884_v49 = vpop.permute.xlu1 %883 }
 0x105   : > { %971 = vst.msk [vmem:[#allocation3 + $0x38] sm:$0xff] %vm963_vm3, %v882_v26 }
 0x106   : > { %972 = vst.msk [vmem:[#allocation3 + $0x40] sm:$0xff] %vm963_vm3, %v884_v49  ;;  %1098 = vrot.lane.b32.xlu2 %v3261_v12, %s2811_s19  ;;  %v429_v12 = vld [vmem:[%s2929_s24 + $0xf8] sm:$0xff]  ;;  %s2815_s24 = smov 28  }
 0x107   : > { %463 = vst.msk [vmem:[#allocation2 + $0x189] sm:$0xff] %vm431_vm0, %v429_v12 }
 0x108   : > { %v904_v63 = vpop.permute.xlu2 %903 }
 0x109   : > { %982 = vst.msk [vmem:[#allocation3 + $0x90] sm:$0xff] %vm963_vm3, %v904_v63 }
 0x10a   : > { %1100 = vrot.lane.b32.xlu0 %v3314_v5, %s2811_s19  ;;  %1102 = vrot.lane.b32.xlu1 %v3282_v54, %s2811_s19 }
 0x10c   : > { %v888_v1 = vpop.permute.xlu0 %887  ;;  %v890_v21 = vpop.permute.xlu1 %889 }
 0x10d   : > { %974 = vst.msk [vmem:[#allocation3 + $0x50] sm:$0xff] %vm963_vm3, %v888_v1 }
 0x10e   : > { %975 = vst.msk [vmem:[#allocation3 + $0x58] sm:$0xff] %vm963_vm3, %v890_v21  ;;  %1104 = vrot.lane.b32.xlu2 %v3332_v34, %s2811_s19  ;;  %v3475_v20 = vld [vmem:[#allocation2 + $0x188] sm:$0xff] }
 0x110   : > { %v910_v56 = vpop.permute.xlu2 %909 }
 0x111   : > { %985 = vst.msk [vmem:[#allocation3 + $0xa8] sm:$0xff] %vm963_vm3, %v910_v56 }
 0x112   : > { %1106 = vrot.lane.b32.xlu0 %v3306_v59, %s2811_s19  ;;  %1108 = vrot.lane.b32.xlu1 %v3338_v7, %s2811_s19 }
 0x114   : > { %v894_v54 = vpop.permute.xlu0 %893  ;;  %v896_v5 = vpop.permute.xlu1 %895 }
 0x115   : > { %977 = vst.msk [vmem:[#allocation3 + $0x68] sm:$0xff] %vm963_vm3, %v894_v54 }
 0x116   : > { %978 = vst.msk [vmem:[#allocation3 + $0x70] sm:$0xff] %vm963_vm3, %v896_v5  ;;  %1110 = vrot.lane.b32.xlu2 %v3318_v16, %s2811_s19 }
 0x118   : > { %v916_v34 = vpop.permute.xlu2 %915 }
 0x119   : > { %988 = vst.msk [vmem:[#allocation3 + $0xc0] sm:$0xff] %vm963_vm3, %v916_v34 }
 0x11a   : > { %1112 = vrot.lane.b32.xlu0 %v3370_v32, %s2811_s19  ;;  %1114 = vrot.lane.b32.xlu1 %v3340_v60, %s2811_s19 }
 0x11c   : > { %v900_v7 = vpop.permute.xlu0 %899  ;;  %v902_v59 = vpop.permute.xlu1 %901 }
 0x11d   : > { %980 = vst.msk [vmem:[#allocation3 + $0x80] sm:$0xff] %vm963_vm3, %v900_v7  ;;  %v3585_v7 = vld [vmem:[#allocation2 + $0x181] sm:$0xff] }
 0x11e   : > { %981 = vst.msk [vmem:[#allocation3 + $0x88] sm:$0xff] %vm963_vm3, %v902_v59  ;;  %1116 = vrot.lane.b32.xlu2 %v3374_v31, %s2811_s19  ;;  %v3587_v59 = vld [vmem:[#allocation2 + $0x189] sm:$0xff] }
 0x120   : > { %v922_v16 = vpop.permute.xlu2 %921 }
 0x121   : > { %991 = vst.msk [vmem:[#allocation3 + $0xd8] sm:$0xff] %vm963_vm3, %v922_v16 }
 0x122   : > { %1118 = vrot.lane.b32.xlu0 %v3356_v24, %s2811_s19  ;;  %1120 = vrot.lane.b32.xlu1 %v3468_v27, %s2811_s19 }
 0x124   : > { %v906_v22 = vpop.permute.xlu0 %905  ;;  %v908_v10 = vpop.permute.xlu1 %907 }
 0x125   : > { %983 = vst.msk [vmem:[#allocation3 + $0x98] sm:$0xff] %vm963_vm3, %v906_v22 }
 0x126   : > { %984 = vst.msk [vmem:[#allocation3 + $0xa0] sm:$0xff] %vm963_vm3, %v908_v10  ;;  %1122 = vrot.lane.b32.xlu2 %v3475_v20, %s2811_s19  ;;  %s390_s19 = sadd.s32 %s2597_s14, %s2594_s25  ;;  %s2818_s14 = smov 1.3862944  }
 0x127   : > { %s2599_s27 = sshll.u32 %s390_s19, 3  ;;  %s2210_s19 = smin.f32 %s2818_s14, %s2209_s12 }
 0x128   : > { %v928_v31 = vpop.permute.xlu2 %927  ;;  %s392_s28 = scalar_lea.vmem %s4144_s4, %s2599_s27  ;;  %s2458_s12 = sshll.u32 %s2455_s29, 4  ;;  %s2459_s12 = int_to_ptr.hbm [resolvable:$true] %s2458_s12 }
 0x129   : > { %994 = vst.msk [vmem:[#allocation3 + $0xf0] sm:$0xff] %vm963_vm3, %v928_v31  ;;  %v3602_v31 = vld [vmem:[#allocation2 + $0x3a] sm:$0xff]  ;;  %s2740_s14 = sshra.s32 %s2459_s12, 4  ;;  %s2741_s14 = int_to_ptr.hbm [resolvable:$true] %s2740_s14 }
 0x12a   : > { %1253 = vrot.lane.b32.xlu0 %v2956_v11, %s2812_s21  ;;  %1255 = vrot.lane.b32.xlu1 %v2973_v18, %s2812_s21  ;;  %v3497_v11 = vld [vmem:[#allocation2 + $0x51] sm:$0xff]  ;;  %p2747_p3 = scmp.lt.s32.totalorder %s2741_s14, %s4147_s7 }
 0x12c   : > { %v912_v37 = vpop.permute.xlu0 %911  ;;  %v914_v46 = vpop.permute.xlu1 %913 }
 0x12d   : > { %986 = vst.msk [vmem:[#allocation3 + $0xb0] sm:$0xff] %vm963_vm3, %v912_v37 }
 0x12e   : > { %987 = vst.msk [vmem:[#allocation3 + $0xb8] sm:$0xff] %vm963_vm3, %v914_v46  ;;  %1257 = vrot.lane.b32.xlu2 %v2967_v17, %s2812_s21 }
 0x130   : > { %v1063_v44 = vpop.permute.xlu2 %1062 }
 0x131   : > { %1158 = vst.msk [vmem:[#allocation3 + $0x8] sm:$0xff] %vm1156_vm4, %v1063_v44 }
 0x132   : > { %1259 = vrot.lane.b32.xlu0 %v2983_v23, %s2812_s21  ;;  %1261 = vrot.lane.b32.xlu1 %v3490_v40, %s2812_s21  ;;  %v1197_v23 = vld [vmem:[#allocation2 + $0x79] sm:$0xff] }
 0x134   : > { %v918_v18 = vpop.permute.xlu0 %917  ;;  %v920_v51 = vpop.permute.xlu1 %919 }
 0x135   : > { %989 = vst.msk [vmem:[#allocation3 + $0xc8] sm:$0xff] %vm963_vm3, %v918_v18 }
 0x136   : > { %990 = vst.msk [vmem:[#allocation3 + $0xd0] sm:$0xff] %vm963_vm3, %v920_v51  ;;  %1263 = vrot.lane.b32.xlu2 %v3497_v11, %s2812_s21 }
 0x138   : > { %v1069_v17 = vpop.permute.xlu2 %1068 }
 0x139   : > { %1161 = vst.msk [vmem:[#allocation3 + $0x20] sm:$0xff] %vm1156_vm4, %v1069_v17 }
 0x13a   : > { %1265 = vrot.lane.b32.xlu0 %v2995_v29, %s2812_s21  ;;  %1267 = vrot.lane.b32.xlu1 %v3001_v30, %s2812_s21  ;;  %v3516_v29 = vld [vmem:[#allocation2 + $0x99] sm:$0xff] }
 0x13c   : > { %v924_v3 = vpop.permute.xlu0 %923  ;;  %v926_v8 = vpop.permute.xlu1 %925 }
 0x13d   : > { %992 = vst.msk [vmem:[#allocation3 + $0xe0] sm:$0xff] %vm963_vm3, %v924_v3 }
 0x13e   : > { %993 = vst.msk [vmem:[#allocation3 + $0xe8] sm:$0xff] %vm963_vm3, %v926_v8  ;;  %1269 = vrot.lane.b32.xlu2 %v1197_v23, %s2812_s21 }
 0x140   : > { %v1075_v43 = vpop.permute.xlu2 %1074 }
 0x141   : > { %1164 = vst.msk [vmem:[#allocation3 + $0x38] sm:$0xff] %vm1156_vm4, %v1075_v43 }
 0x142   : > { %1271 = vrot.lane.b32.xlu0 %v3010_v35, %s2812_s21  ;;  %1273 = vrot.lane.b32.xlu1 %v3016_v36, %s2812_s21  ;;  %v3527_v35 = vld [vmem:[#allocation2 + $0xc1] sm:$0xff] }
 0x144   : > { %v930_v30 = vpop.permute.xlu0 %929  ;;  %v1061_v9 = vpop.permute.xlu1 %1060 }
 0x145   : > { %995 = vst.msk [vmem:[#allocation3 + $0xf8] sm:$0xff] %vm963_vm3, %v930_v30  ;;  %v4181_v30 = vld [vmem:[#allocation12_spill] sm:$0xff] }
 0x146   : > { %1157 = vst.msk [vmem:[#allocation3] sm:$0xff] %vm1156_vm4, %v1061_v9  ;;  %1275 = vrot.lane.b32.xlu2 %v3516_v29, %s2812_s21 }
 0x148   : > { %v1081_v28 = vpop.permute.xlu2 %1080 }
 0x149   : > { %1167 = vst.msk [vmem:[#allocation3 + $0x50] sm:$0xff] %vm1156_vm4, %v1081_v28  ;;  %v526_v28 = vld [vmem:[#allocation2 + $0x190] sm:$0x1] }
 0x14a   : > { %1277 = vrot.lane.b32.xlu0 %v3025_v41, %s2812_s21  ;;  %1279 = vrot.lane.b32.xlu1 %v3031_v42, %s2812_s21  ;;  %v1206_v41 = vld [vmem:[#allocation2 + $0xe1] sm:$0xff]  ;;  %544 = vst.msk [vmem:[#allocation2 + $0x191] sm:$0x1] %vm491_vm1, %v526_v28 }
 0x14c   : > { %v1065_v36 = vpop.permute.xlu0 %1064  ;;  %v1067_v13 = vpop.permute.xlu1 %1066 }
 0x14d   : > { %1159 = vst.msk [vmem:[#allocation3 + $0x10] sm:$0xff] %vm1156_vm4, %v1065_v36  ;;  %v4182_v36 = vld [vmem:[#allocation13_spill] sm:$0xff] }
 0x14e   : > { %1160 = vst.msk [vmem:[#allocation3 + $0x18] sm:$0xff] %vm1156_vm4, %v1067_v13  ;;  %1281 = vrot.lane.b32.xlu2 %v3527_v35, %s2812_s21 }
 0x150   : > { %v1087_v26 = vpop.permute.xlu2 %1086 }
 0x151   : > { %1170 = vst.msk [vmem:[#allocation3 + $0x68] sm:$0xff] %vm1156_vm4, %v1087_v26 }
 0x152   : > { %1283 = vrot.lane.b32.xlu0 %v3040_v47, %s2812_s21  ;;  %1285 = vrot.lane.b32.xlu1 %v3046_v48, %s2812_s21  ;;  %v3546_v47 = vld [vmem:[#allocation2 + $0x109] sm:$0xff] }
 0x154   : > { %v1071_v42 = vpop.permute.xlu0 %1070  ;;  %v1073_v49 = vpop.permute.xlu1 %1072 }
 0x155   : > { %1162 = vst.msk [vmem:[#allocation3 + $0x28] sm:$0xff] %vm1156_vm4, %v1071_v42 }
 0x156   : > { %1163 = vst.msk [vmem:[#allocation3 + $0x30] sm:$0xff] %vm1156_vm4, %v1073_v49  ;;  %1287 = vrot.lane.b32.xlu2 %v1206_v41, %s2812_s21  ;;  %v4184_v41 = vld [vmem:[#allocation15_spill] sm:$0xff]  ;;  %v4185_v49 = vld [vmem:[#allocation16_spill] sm:$0xff] }
 0x158   : > { %v1093_v63 = vpop.permute.xlu2 %1092 }
 0x159   : > { %1173 = vst.msk [vmem:[#allocation3 + $0x80] sm:$0xff] %vm1156_vm4, %v1093_v63  ;;  %v4186_v63 = vld [vmem:[#allocation17_spill] sm:$0xff] }
 0x15a   : > { %1289 = vrot.lane.b32.xlu0 %v3053_v52, %s2812_s21  ;;  %1291 = vrot.lane.b32.xlu1 %v3058_v53, %s2812_s21  ;;  %v3557_v52 = vld [vmem:[#allocation2 + $0x129] sm:$0xff] }
 0x15c   : > { %v1077_v48 = vpop.permute.xlu0 %1076  ;;  %v1079_v1 = vpop.permute.xlu1 %1078 }
 0x15d   : > { %1165 = vst.msk [vmem:[#allocation3 + $0x40] sm:$0xff] %vm1156_vm4, %v1077_v48 }
 0x15e   : > { %1166 = vst.msk [vmem:[#allocation3 + $0x48] sm:$0xff] %vm1156_vm4, %v1079_v1  ;;  %1293 = vrot.lane.b32.xlu2 %v3546_v47, %s2812_s21 }
 0x160   : > { %v1099_v21 = vpop.permute.xlu2 %1098 }
 0x161   : > { %1176 = vst.msk [vmem:[#allocation3 + $0x98] sm:$0xff] %vm1156_vm4, %v1099_v21  ;;  %v4187_v21 = vld [vmem:[#allocation18_spill] sm:$0xff] }
 0x162   : > { %1295 = vrot.lane.b32.xlu0 %v3065_v57, %s2812_s21  ;;  %1297 = vrot.lane.b32.xlu1 %v3070_v58, %s2812_s21  ;;  %v3568_v57 = vld [vmem:[#allocation2 + $0x151] sm:$0xff] }
 0x164   : > { %v1083_v53 = vpop.permute.xlu0 %1082  ;;  %v1085_v56 = vpop.permute.xlu1 %1084 }
 0x165   : > { %1168 = vst.msk [vmem:[#allocation3 + $0x58] sm:$0xff] %vm1156_vm4, %v1083_v53 }
 0x166   : > { %1169 = vst.msk [vmem:[#allocation3 + $0x60] sm:$0xff] %vm1156_vm4, %v1085_v56  ;;  %1299 = vrot.lane.b32.xlu2 %v3557_v52, %s2812_s21  ;;  %v4188_v56 = vld [vmem:[#allocation19_spill] sm:$0xff] }
 0x168   : > { %v1105_v12 = vpop.permute.xlu2 %1104 }
 0x169   : > { %1179 = vst.msk [vmem:[#allocation3 + $0xb0] sm:$0xff] %vm1156_vm4, %v1105_v12  ;;  %v4189_v12 = vld [vmem:[#allocation20_spill] sm:$0xff] }
 0x16a   : > { %1301 = vrot.lane.b32.xlu0 %v3076_v61, %s2812_s21  ;;  %1303 = vrot.lane.b32.xlu1 %v3080_v62, %s2812_s21  ;;  %v3579_v61 = vld [vmem:[#allocation2 + $0x171] sm:$0xff] }
 0x16c   : > { %v1089_v58 = vpop.permute.xlu0 %1088  ;;  %v1091_v54 = vpop.permute.xlu1 %1090 }
 0x16d   : > { %1171 = vst.msk [vmem:[#allocation3 + $0x70] sm:$0xff] %vm1156_vm4, %v1089_v58 }
 0x16e   : > { %1172 = vst.msk [vmem:[#allocation3 + $0x78] sm:$0xff] %vm1156_vm4, %v1091_v54  ;;  %1305 = vrot.lane.b32.xlu2 %v3568_v57, %s2812_s21 }
 0x170   : > { %v1111_v5 = vpop.permute.xlu2 %1110 }
 0x171   : > { %1182 = vst.msk [vmem:[#allocation3 + $0xc8] sm:$0xff] %vm1156_vm4, %v1111_v5  ;;  %v4190_v5 = vld [vmem:[#allocation21_spill] sm:$0xff] }
 0x172   : > { %1307 = vrot.lane.b32.xlu0 %v3085_v2, %s2812_s21  ;;  %1309 = vrot.lane.b32.xlu1 %v3092_v4, %s2812_s21  ;;  %v1382_v2 = vld [vmem:[#allocation2 + $0x1a] sm:$0xff] }
 0x174   : > { %v1095_v62 = vpop.permute.xlu0 %1094  ;;  %v1097_v34 = vpop.permute.xlu1 %1096 }
 0x175   : > { %1174 = vst.msk [vmem:[#allocation3 + $0x88] sm:$0xff] %vm1156_vm4, %v1095_v62 }
 0x176   : > { %1175 = vst.msk [vmem:[#allocation3 + $0x90] sm:$0xff] %vm1156_vm4, %v1097_v34  ;;  %1311 = vrot.lane.b32.xlu2 %v3579_v61, %s2812_s21  ;;  %v4191_v34 = vld [vmem:[#allocation22_spill] sm:$0xff] }
 0x178   : > { %v1117_v16 = vpop.permute.xlu2 %1116 }
 0x179   : > { %1185 = vst.msk [vmem:[#allocation3 + $0xe0] sm:$0xff] %vm1156_vm4, %v1117_v16  ;;  %v4192_v16 = vld [vmem:[#allocation23_spill] sm:$0xff] }
 0x17a   : > { %1313 = vrot.lane.b32.xlu0 %v3585_v7, %s2812_s21  ;;  %1315 = vrot.lane.b32.xlu1 %v3587_v59, %s2812_s21 }
 0x17c   : > { %v1101_v4 = vpop.permute.xlu0 %1100  ;;  %v1103_v22 = vpop.permute.xlu1 %1102 }
 0x17d   : > { %1177 = vst.msk [vmem:[#allocation3 + $0xa0] sm:$0xff] %vm1156_vm4, %v1101_v4 }
 0x17e   : > { %1178 = vst.msk [vmem:[#allocation3 + $0xa8] sm:$0xff] %vm1156_vm4, %v1103_v22  ;;  %1446 = vrot.lane.b32.xlu2 %v1382_v2, %s2813_s22  ;;  %v4193_v22 = vld [vmem:[#allocation24_spill] sm:$0xff] }
 0x180   : > { %v1123_v10 = vpop.permute.xlu2 %1122 }
 0x181   : > { %1188 = vst.msk [vmem:[#allocation3 + $0xf8] sm:$0xff] %vm1156_vm4, %v1123_v10 }
 0x182   : > { %1448 = vrot.lane.b32.xlu0 %v3108_v19, %s2813_s22  ;;  %1450 = vrot.lane.b32.xlu1 %v3124_v25, %s2813_s22  ;;  %v3613_v19 = vld [vmem:[#allocation2 + $0x62] sm:$0xff] }
 0x184   : > { %v1107_v37 = vpop.permute.xlu0 %1106  ;;  %v1109_v46 = vpop.permute.xlu1 %1108 }
 0x185   : > { %1180 = vst.msk [vmem:[#allocation3 + $0xb8] sm:$0xff] %vm1156_vm4, %v1107_v37  ;;  %v4194_v37 = vld [vmem:[#allocation25_spill] sm:$0xff] }
 0x186   : > { %1181 = vst.msk [vmem:[#allocation3 + $0xc0] sm:$0xff] %vm1156_vm4, %v1109_v46  ;;  %1452 = vrot.lane.b32.xlu2 %v3602_v31, %s2813_s22  ;;  %v3692_v46 = vld [vmem:[#allocation2 + $0x182] sm:$0xff] }
 0x188   : > { %v1258_v44 = vpop.permute.xlu2 %1257 }
 0x189   : > { %1352 = vst.msk [vmem:[#allocation3 + $0x10] sm:$0xff] %vm1349_vm5, %v1258_v44 }
 0x18a   : > { %1454 = vrot.lane.b32.xlu0 %v3137_v33, %s2813_s22  ;;  %1456 = vrot.lane.b32.xlu1 %v3148_v38, %s2813_s22  ;;  %v3624_v33 = vld [vmem:[#allocation2 + $0x82] sm:$0xff] }
 0x18c   : > { %v1113_v25 = vpop.permute.xlu0 %1112  ;;  %v1115_v18 = vpop.permute.xlu1 %1114 }
 0x18d   : > { %1183 = vst.msk [vmem:[#allocation3 + $0xd0] sm:$0xff] %vm1156_vm4, %v1113_v25 }
 0x18e   : > { %1184 = vst.msk [vmem:[#allocation3 + $0xd8] sm:$0xff] %vm1156_vm4, %v1115_v18  ;;  %1458 = vrot.lane.b32.xlu2 %v3613_v19, %s2813_s22  ;;  %v3698_v18 = vld [vmem:[#allocation2 + $0x18a] sm:$0xff] }
 0x190   : > { %v1264_v51 = vpop.permute.xlu2 %1263 }
 0x191   : > { %1355 = vst.msk [vmem:[#allocation3 + $0x28] sm:$0xff] %vm1349_vm5, %v1264_v51  ;;  %v1576_v51 = vld [vmem:[#allocation2 + $0x30] sm:$0xff] }
 0x192   : > { %1460 = vrot.lane.b32.xlu0 %v3157_v45, %s2813_s22  ;;  %1462 = vrot.lane.b32.xlu1 %v3172_v55, %s2813_s22  ;;  %v3635_v45 = vld [vmem:[#allocation2 + $0xaa] sm:$0xff] }
 0x194   : > { %v1119_v38 = vpop.permute.xlu0 %1118  ;;  %v1121_v17 = vpop.permute.xlu1 %1120 }
 0x195   : > { %1186 = vst.msk [vmem:[#allocation3 + $0xe8] sm:$0xff] %vm1156_vm4, %v1119_v38 }
 0x196   : > { %1187 = vst.msk [vmem:[#allocation3 + $0xf0] sm:$0xff] %vm1156_vm4, %v1121_v17  ;;  %1464 = vrot.lane.b32.xlu2 %v3624_v33, %s2813_s22 }
 0x198   : > { %v1270_v23 = vpop.permute.xlu2 %1269 }
 0x199   : > { %1358 = vst.msk [vmem:[#allocation3 + $0x40] sm:$0xff] %vm1349_vm5, %v1270_v23 }
 0x19a   : > { %1466 = vrot.lane.b32.xlu0 %v3181_v0, %s2813_s22  ;;  %1468 = vrot.lane.b32.xlu1 %v3187_v6, %s2813_s22  ;;  %v4180_v0 = vld [vmem:[#allocation11_spill] sm:$0xff] }
 0x19c   : > { %v1254_v55 = vpop.permute.xlu0 %1253  ;;  %v1256_v3 = vpop.permute.xlu1 %1255 }
 0x19d   : > { %1350 = vst.msk [vmem:[#allocation3] sm:$0xff] %vm1349_vm5, %v1254_v55  ;;  %v1578_v55 = vld [vmem:[#allocation2 + $0x48] sm:$0xff] }
 0x19e   : > { %1351 = vst.msk [vmem:[#allocation3 + $0x8] sm:$0xff] %vm1349_vm5, %v1256_v3  ;;  %1470 = vrot.lane.b32.xlu2 %v3635_v45, %s2813_s22  ;;  %v1579_v3 = vld [vmem:[#allocation2 + $0x50] sm:$0xff] }
 0x1a0   : > { %v1276_v8 = vpop.permute.xlu2 %1275 }
 0x1a1   : > { %1361 = vst.msk [vmem:[#allocation3 + $0x58] sm:$0xff] %vm1349_vm5, %v1276_v8 }
 0x1a2   : > { %1472 = vrot.lane.b32.xlu0 %v3208_v14, %s2813_s22  ;;  %1474 = vrot.lane.b32.xlu1 %v4180_v0, %s2813_s22  ;;  %v4183_v14 = vld [vmem:[#allocation14_spill] sm:$0xff]  ;;  %v1580_v0 = vld [vmem:[#allocation2 + $0x60] sm:$0xff] }
 0x1a4   : > { %v1260_v6 = vpop.permute.xlu0 %1259  ;;  %v1262_v43 = vpop.permute.xlu1 %1261 }
 0x1a5   : > { %1353 = vst.msk [vmem:[#allocation3 + $0x18] sm:$0xff] %vm1349_vm5, %v1260_v6 }
 0x1a6   : > { %1354 = vst.msk [vmem:[#allocation3 + $0x20] sm:$0xff] %vm1349_vm5, %v1262_v43  ;;  %1476 = vrot.lane.b32.xlu2 %v4181_v30, %s2813_s22  ;;  %v1581_v30 = vld [vmem:[#allocation2 + $0x68] sm:$0xff] }
 0x1a8   : > { %v1282_v9 = vpop.permute.xlu2 %1281 }
 0x1a9   : > { %1364 = vst.msk [vmem:[#allocation3 + $0x70] sm:$0xff] %vm1349_vm5, %v1282_v9  ;;  %v1582_v9 = vld [vmem:[#allocation2 + $0x78] sm:$0xff] }
 0x1aa   : > { %1478 = vrot.lane.b32.xlu0 %v4182_v36, %s2813_s22  ;;  %1480 = vrot.lane.b32.xlu1 %v4183_v14, %s2813_s22  ;;  %v1583_v36 = vld [vmem:[#allocation2 + $0x80] sm:$0xff] }
 0x1ac   : > { %v1266_v13 = vpop.permute.xlu0 %1265  ;;  %v1268_v26 = vpop.permute.xlu1 %1267 }
 0x1ad   : > { %1356 = vst.msk [vmem:[#allocation3 + $0x30] sm:$0xff] %vm1349_vm5, %v1266_v13 }
 0x1ae   : > { %1357 = vst.msk [vmem:[#allocation3 + $0x38] sm:$0xff] %vm1349_vm5, %v1268_v26  ;;  %1482 = vrot.lane.b32.xlu2 %v4184_v41, %s2813_s22  ;;  %v1584_v26 = vld [vmem:[#allocation2 + $0x90] sm:$0xff]  ;;  %v1585_v41 = vld [vmem:[#allocation2 + $0x98] sm:$0xff] }
 0x1b0   : > { %v1288_v42 = vpop.permute.xlu2 %1287 }
 0x1b1   : > { %1367 = vst.msk [vmem:[#allocation3 + $0x88] sm:$0xff] %vm1349_vm5, %v1288_v42 }
 0x1b2   : > { %1484 = vrot.lane.b32.xlu0 %v4185_v49, %s2813_s22  ;;  %1486 = vrot.lane.b32.xlu1 %v4186_v63, %s2813_s22  ;;  %v1586_v49 = vld [vmem:[#allocation2 + $0xa8] sm:$0xff] }
 0x1b4   : > { %v1272_v48 = vpop.permute.xlu0 %1271  ;;  %v1274_v1 = vpop.permute.xlu1 %1273 }
 0x1b5   : > { %1359 = vst.msk [vmem:[#allocation3 + $0x48] sm:$0xff] %vm1349_vm5, %v1272_v48 }
 0x1b6   : > { %1360 = vst.msk [vmem:[#allocation3 + $0x50] sm:$0xff] %vm1349_vm5, %v1274_v1  ;;  %1488 = vrot.lane.b32.xlu2 %v4187_v21, %s2813_s22  ;;  %v1587_v1 = vld [vmem:[#allocation2 + $0xb0] sm:$0xff]  ;;  %v1588_v21 = vld [vmem:[#allocation2 + $0xc0] sm:$0xff] }
 0x1b8   : > { %v1294_v53 = vpop.permute.xlu2 %1293 }
 0x1b9   : > { %1370 = vst.msk [vmem:[#allocation3 + $0xa0] sm:$0xff] %vm1349_vm5, %v1294_v53 }
 0x1ba   : > { %1490 = vrot.lane.b32.xlu0 %v4188_v56, %s2813_s22  ;;  %1492 = vrot.lane.b32.xlu1 %v4189_v12, %s2813_s22  ;;  %v1589_v56 = vld [vmem:[#allocation2 + $0xc8] sm:$0xff] }
 0x1bc   : > { %v1278_v58 = vpop.permute.xlu0 %1277  ;;  %v1280_v54 = vpop.permute.xlu1 %1279 }
 0x1bd   : > { %1362 = vst.msk [vmem:[#allocation3 + $0x60] sm:$0xff] %vm1349_vm5, %v1278_v58 }
 0x1be   : > { %1363 = vst.msk [vmem:[#allocation3 + $0x68] sm:$0xff] %vm1349_vm5, %v1280_v54  ;;  %1494 = vrot.lane.b32.xlu2 %v4190_v5, %s2813_s22  ;;  %v1593_v5 = vld [vmem:[#allocation2 + $0xf8] sm:$0xff] }
 0x1c0   : > { %v1300_v62 = vpop.permute.xlu2 %1299 }
 0x1c1   : > { %1373 = vst.msk [vmem:[#allocation3 + $0xb8] sm:$0xff] %vm1349_vm5, %v1300_v62 }
 0x1c2   : > { %1496 = vrot.lane.b32.xlu0 %v4191_v34, %s2813_s22  ;;  %1498 = vrot.lane.b32.xlu1 %v4192_v16, %s2813_s22 }
 0x1c4   : > { %v1284_v2 = vpop.permute.xlu0 %1283  ;;  %v1286_v4 = vpop.permute.xlu1 %1285 }
 0x1c5   : > { %1365 = vst.msk [vmem:[#allocation3 + $0x78] sm:$0xff] %vm1349_vm5, %v1284_v2 }
 0x1c6   : > { %1366 = vst.msk [vmem:[#allocation3 + $0x80] sm:$0xff] %vm1349_vm5, %v1286_v4  ;;  %1500 = vrot.lane.b32.xlu2 %v4193_v22, %s2813_s22  ;;  %v1786_v4 = vld [vmem:[#allocation2 + $0xf9] sm:$0xff] }
 0x1c8   : > { %v1306_v10 = vpop.permute.xlu2 %1305 }
 0x1c9   : > { %1376 = vst.msk [vmem:[#allocation3 + $0xd0] sm:$0xff] %vm1349_vm5, %v1306_v10 }
 0x1ca   : > { %1502 = vrot.lane.b32.xlu0 %v3351_v15, %s2813_s22  ;;  %1504 = vrot.lane.b32.xlu1 %v4194_v37, %s2813_s22  ;;  %v1577_v15 = vld [vmem:[#allocation2 + $0x38] sm:$0xff] }
 0x1cb   : > { %v1978_v37 = vld [vmem:[#allocation2 + $0xf2] sm:$0xff] }
 0x1cc   : > { %v1290_v44 = vpop.permute.xlu0 %1289  ;;  %v1292_v25 = vpop.permute.xlu1 %1291 }
 0x1cd   : > { %1368 = vst.msk [vmem:[#allocation3 + $0x90] sm:$0xff] %vm1349_vm5, %v1290_v44  ;;  %v1979_v44 = vld [vmem:[#allocation2 + $0xfa] sm:$0xff] }
 0x1ce   : > { %1369 = vst.msk [vmem:[#allocation3 + $0x98] sm:$0xff] %vm1349_vm5, %v1292_v25  ;;  %1506 = vrot.lane.b32.xlu2 %v3692_v46, %s2813_s22 }
 0x1d0   : > { %v1312_v38 = vpop.permute.xlu2 %1311 }
 0x1d1   : > { %1379 = vst.msk [vmem:[#allocation3 + $0xe8] sm:$0xff] %vm1349_vm5, %v1312_v38 }
 0x1d2   : > { %1508 = vrot.lane.b32.xlu0 %v3698_v18, %s2813_s22  ;;  %1640 = vrot.lane.b32.xlu1 %v1576_v51, %s2814_s23 }
 0x1d4   : > { %v1296_v17 = vpop.permute.xlu0 %1295  ;;  %v1298_v23 = vpop.permute.xlu1 %1297 }
 0x1d5   : > { %1371 = vst.msk [vmem:[#allocation3 + $0xa8] sm:$0xff] %vm1349_vm5, %v1296_v17  ;;  %v1769_v17 = vld [vmem:[#allocation2 + $0x31] sm:$0xff] }
 0x1d6   : > { %1372 = vst.msk [vmem:[#allocation3 + $0xb0] sm:$0xff] %vm1349_vm5, %v1298_v23  ;;  %1642 = vrot.lane.b32.xlu2 %v1577_v15, %s2814_s23  ;;  %v1987_v15 = vld [vmem:[#allocation2 + $0x15a] sm:$0xff] }
 0x1d8   : > { %v1447_v8 = vpop.permute.xlu2 %1446 }
 0x1d9   : > { %1543 = vst.msk [vmem:[#allocation3] sm:$0xff] %vm1542_vm6, %v1447_v8 }
 0x1da   : > { %1644 = vrot.lane.b32.xlu0 %v1578_v55, %s2814_s23  ;;  %1646 = vrot.lane.b32.xlu1 %v1579_v3, %s2814_s23  ;;  %v1770_v55 = vld [vmem:[#allocation2 + $0x39] sm:$0xff] }
 0x1dc   : > { %v1302_v6 = vpop.permute.xlu0 %1301  ;;  %v1304_v43 = vpop.permute.xlu1 %1303 }
 0x1dd   : > { %1374 = vst.msk [vmem:[#allocation3 + $0xc0] sm:$0xff] %vm1349_vm5, %v1302_v6 }
 0x1de   : > { %1375 = vst.msk [vmem:[#allocation3 + $0xc8] sm:$0xff] %vm1349_vm5, %v1304_v43  ;;  %1648 = vrot.lane.b32.xlu2 %v1580_v0, %s2814_s23  ;;  %v1777_v0 = vld [vmem:[#allocation2 + $0x91] sm:$0xff] }
 0x1df   : > { %v1962_v43 = vld [vmem:[#allocation2 + $0x32] sm:$0xff] }
 0x1e0   : > { %v1453_v28 = vpop.permute.xlu2 %1452 }
 0x1e1   : > { %1546 = vst.msk [vmem:[#allocation3 + $0x18] sm:$0xff] %vm1542_vm6, %v1453_v28  ;;  %v1970_v28 = vld [vmem:[#allocation2 + $0x92] sm:$0xff] }
 0x1e2   : > { %1650 = vrot.lane.b32.xlu0 %v1581_v30, %s2814_s23  ;;  %1652 = vrot.lane.b32.xlu1 %v1582_v9, %s2814_s23 }
 0x1e4   : > { %v1308_v14 = vpop.permute.xlu0 %1307  ;;  %v1310_v13 = vpop.permute.xlu1 %1309 }
 0x1e5   : > { %1377 = vst.msk [vmem:[#allocation3 + $0xd8] sm:$0xff] %vm1349_vm5, %v1308_v14  ;;  %v1971_v14 = vld [vmem:[#allocation2 + $0x9a] sm:$0xff] }
 0x1e6   : > { %1378 = vst.msk [vmem:[#allocation3 + $0xe0] sm:$0xff] %vm1349_vm5, %v1310_v13  ;;  %1654 = vrot.lane.b32.xlu2 %v1583_v36, %s2814_s23 }
 0x1e8   : > { %v1459_v42 = vpop.permute.xlu2 %1458 }
 0x1e9   : > { %1549 = vst.msk [vmem:[#allocation3 + $0x30] sm:$0xff] %vm1542_vm6, %v1459_v42 }
 0x1ea   : > { %1656 = vrot.lane.b32.xlu0 %v1584_v26, %s2814_s23  ;;  %1658 = vrot.lane.b32.xlu1 %v1585_v41, %s2814_s23  ;;  %v1594_v26 = vld [vmem:[#allocation2 + $0x108] sm:$0xff]  ;;  %v1595_v41 = vld [vmem:[#allocation2 + $0x110] sm:$0xff] }
 0x1ec   : > { %v1314_v63 = vpop.permute.xlu0 %1313  ;;  %v1316_v48 = vpop.permute.xlu1 %1315 }
 0x1ed   : > { %1380 = vst.msk [vmem:[#allocation3 + $0xf0] sm:$0xff] %vm1349_vm5, %v1314_v63 }
 0x1ee   : > { %1381 = vst.msk [vmem:[#allocation3 + $0xf8] sm:$0xff] %vm1349_vm5, %v1316_v48  ;;  %1660 = vrot.lane.b32.xlu2 %v1586_v49, %s2814_s23 }
 0x1f0   : > { %v1465_v53 = vpop.permute.xlu2 %1464 }
 0x1f1   : > { %1552 = vst.msk [vmem:[#allocation3 + $0x48] sm:$0xff] %vm1542_vm6, %v1465_v53 }
 0x1f2   : > { %1662 = vrot.lane.b32.xlu0 %v1587_v1, %s2814_s23  ;;  %1664 = vrot.lane.b32.xlu1 %v1588_v21, %s2814_s23  ;;  %v1788_v1 = vld [vmem:[#allocation2 + $0x111] sm:$0xff] }
 0x1f4   : > { %v1449_v12 = vpop.permute.xlu0 %1448  ;;  %v1451_v58 = vpop.permute.xlu1 %1450 }
 0x1f5   : > { %1544 = vst.msk [vmem:[#allocation3 + $0x8] sm:$0xff] %vm1542_vm6, %v1449_v12 }
 0x1f6   : > { %1545 = vst.msk [vmem:[#allocation3 + $0x10] sm:$0xff] %vm1542_vm6, %v1451_v58  ;;  %1666 = vrot.lane.b32.xlu2 %v1589_v56, %s2814_s23  ;;  %v1795_v56 = vld [vmem:[#allocation2 + $0x169] sm:$0xff] }
 0x1f8   : > { %v1471_v54 = vpop.permute.xlu2 %1470 }
 0x1f9   : > { %1555 = vst.msk [vmem:[#allocation3 + $0x60] sm:$0xff] %vm1542_vm6, %v1471_v54  ;;  %v1981_v54 = vld [vmem:[#allocation2 + $0x112] sm:$0xff] }
 0x1fa   : > { %1668 = vrot.lane.b32.xlu0 %v3274_v39, %s2814_s23  ;;  %1672 = vrot.lane.b32.xlu1 %v3280_v50, %s2814_s23  ;;  %v1785_v39 = vld [vmem:[#allocation2 + $0xf1] sm:$0xff] }
 0x1fc   : > { %v1455_v62 = vpop.permute.xlu0 %1454  ;;  %v1457_v34 = vpop.permute.xlu1 %1456 }
 0x1fd   : > { %1547 = vst.msk [vmem:[#allocation3 + $0x20] sm:$0xff] %vm1542_vm6, %v1455_v62 }
 0x1fe   : > { %1548 = vst.msk [vmem:[#allocation3 + $0x28] sm:$0xff] %vm1542_vm6, %v1457_v34  ;;  %1674 = vrot.lane.b32.xlu2 %v1593_v5, %s2814_s23  ;;  %v1988_v5 = vld [vmem:[#allocation2 + $0x16a] sm:$0xff]  ;;  %v1989_v34 = vld [vmem:[#allocation2 + $0x172] sm:$0xff] }
 0x200   : > { %v1477_v16 = vpop.permute.xlu2 %1476 }
 0x201   : > { %1558 = vst.msk [vmem:[#allocation3 + $0x78] sm:$0xff] %vm1542_vm6, %v1477_v16 }
 0x202   : > { %1688 = vrot.lane.b32.xlu0 %v3370_v32, %s2814_s23  ;;  %1690 = vrot.lane.b32.xlu1 %v3340_v60, %s2814_s23  ;;  %v1794_v60 = vld [vmem:[#allocation2 + $0x159] sm:$0xff] }
 0x204   : > { %v1461_v50 = vpop.permute.xlu0 %1460  ;;  %v1463_v2 = vpop.permute.xlu1 %1462 }
 0x205   : > { %1550 = vst.msk [vmem:[#allocation3 + $0x38] sm:$0xff] %vm1542_vm6, %v1461_v50  ;;  %v1779_v50 = vld [vmem:[#allocation2 + $0xa9] sm:$0xff] }
 0x206   : > { %1551 = vst.msk [vmem:[#allocation3 + $0x40] sm:$0xff] %vm1542_vm6, %v1463_v2  ;;  %1865 = vrot.lane.b32.xlu2 %v1785_v39, %s2815_s24 }
 0x208   : > { %v1483_v22 = vpop.permute.xlu2 %1482 }
 0x209   : > { %1561 = vst.msk [vmem:[#allocation3 + $0x90] sm:$0xff] %vm1542_vm6, %v1483_v22  ;;  %v1780_v22 = vld [vmem:[#allocation2 + $0xb1] sm:$0xff] }
 0x20a   : > { %1867 = vrot.lane.b32.xlu0 %v1786_v4, %s2815_s24  ;;  %1881 = vrot.lane.b32.xlu1 %v3568_v57, %s2815_s24  ;;  %v1986_v57 = vld [vmem:[#allocation2 + $0x152] sm:$0xff] }
 0x20c   : > { %v1467_v32 = vpop.permute.xlu0 %1466  ;;  %v1469_v10 = vpop.permute.xlu1 %1468 }
 0x20d   : > { %1553 = vst.msk [vmem:[#allocation3 + $0x50] sm:$0xff] %vm1542_vm6, %v1467_v32 }
 0x20e   : > { %1554 = vst.msk [vmem:[#allocation3 + $0x58] sm:$0xff] %vm1542_vm6, %v1469_v10  ;;  %1883 = vrot.lane.b32.xlu2 %v1794_v60, %s2815_s24  ;;  %v1964_v60 = vld [vmem:[#allocation2 + $0x4a] sm:$0xff] }
 0x210   : > { %v1489_v25 = vpop.permute.xlu2 %1488 }
 0x211   : > { %1564 = vst.msk [vmem:[#allocation3 + $0xa8] sm:$0xff] %vm1542_vm6, %v1489_v25 }
 0x212   : > { %2058 = vrot.lane.b32.xlu0 %v1978_v37, %s2816_s26  ;;  %2060 = vrot.lane.b32.xlu1 %v1979_v44, %s2816_s26  ;;  %v2207_v37 = vld [vmem:[%s4145_s5 + $0x10] sm:$0x3]  ;;  %v1973_v44 = vld [vmem:[#allocation2 + $0xb2] sm:$0xff] }
 0x213   : > { %v2224_v25 = vunpack.c.l.b16 %v2207_v37 }
 0x214   : > { %v1473_v51 = vpop.permute.xlu0 %1472  ;;  %v1475_v38 = vpop.permute.xlu1 %1474 }
 0x215   : > { %1556 = vst.msk [vmem:[#allocation3 + $0x68] sm:$0xff] %vm1542_vm6, %v1473_v51  ;;  %v2227_v51 = vpack.c.b16 %v2224_v25, %v2224_v25 }
 0x216   : > { %1557 = vst.msk [vmem:[#allocation3 + $0x70] sm:$0xff] %vm1542_vm6, %v1475_v38  ;;  %2074 = vrot.lane.b32.xlu2 %v1986_v57, %s2816_s26  ;;  %v1596_v38 = vld [vmem:[#allocation2 + $0x120] sm:$0xff] }
 0x218   : > { %v1495_v23 = vpop.permute.xlu2 %1494 }
 0x219   : > { %1567 = vst.msk [vmem:[#allocation3 + $0xc0] sm:$0xff] %vm1542_vm6, %v1495_v23 }
 0x21a   : > { %2076 = vrot.lane.b32.xlu0 %v1987_v15, %s2816_s26  ;;  %1833 = vrot.lane.b32.xlu1 %v1769_v17, %s2815_s24  ;;  %v2281_v15 = vsel %vm2279_vm8, %v2227_v51, 0 }
 0x21b   : > { %2634 = vmatpush.bf16.msra.mxu2 %v2281_v15  ;;  %2635 = vmatpush.bf16.msra.mxu3 %v2281_v15 }
 0x21c   : > { %v1479_v3 = vpop.permute.xlu0 %1478  ;;  %v1481_v8 = vpop.permute.xlu1 %1480  ;;  %2288 = vmatpush.bf16.msra.mxu0 %v2281_v15  ;;  %2633 = vmatpush.bf16.msra.mxu1 %v2281_v15 }
 0x21d   : > { %1559 = vst.msk [vmem:[#allocation3 + $0x80] sm:$0xff] %vm1542_vm6, %v1479_v3 }
 0x21e   : > { %1560 = vst.msk [vmem:[#allocation3 + $0x88] sm:$0xff] %vm1542_vm6, %v1481_v8  ;;  %1835 = vrot.lane.b32.xlu2 %v1770_v55, %s2815_s24  ;;  %v1597_v55 = vld [vmem:[#allocation2 + $0x128] sm:$0xff]  ;;  %v2630_v8 = vld [vmem:[%s4145_s5] sm:$0xff] }
 0x220   : > { %v1501_v6 = vpop.permute.xlu2 %1500 }
 0x221   : > { %1570 = vst.msk [vmem:[#allocation3 + $0xd8] sm:$0xff] %vm1542_vm6, %v1501_v6 }
 0x222   : > { %1849 = vrot.lane.b32.xlu0 %v1777_v0, %s2815_s24  ;;  %1851 = vrot.lane.b32.xlu1 %v3516_v29, %s2815_s24 }
 0x224   : > { %v1485_v30 = vpop.permute.xlu0 %1484  ;;  %v1487_v9 = vpop.permute.xlu1 %1486 }
 0x225   : > { %1562 = vst.msk [vmem:[#allocation3 + $0x98] sm:$0xff] %vm1542_vm6, %v1485_v30  ;;  %v468_v30 = vld [vmem:[%s392_s28] sm:$0xff] }
 0x226   : > { %1563 = vst.msk [vmem:[#allocation3 + $0xa0] sm:$0xff] %vm1542_vm6, %v1487_v9  ;;  %2026 = vrot.lane.b32.xlu2 %v1962_v43, %s2816_s26 }
 0x227   : > { %471 = vst.msk [vmem:[#allocation2 + $0x199] sm:$0xff] %vm431_vm0, %v468_v30 }
 0x228   : > { %v1507_v36 = vpop.permute.xlu2 %1506 }
 0x229   : > { %1573 = vst.msk [vmem:[#allocation3 + $0xf0] sm:$0xff] %vm1542_vm6, %v1507_v36 }
 0x22a   : > { %2028 = vrot.lane.b32.xlu0 %v3602_v31, %s2816_s26  ;;  %2042 = vrot.lane.b32.xlu1 %v1970_v28, %s2816_s26  ;;  %v1602_v31 = vld [vmem:[#allocation2 + $0x168] sm:$0xff] }
 0x22c   : > { %v1491_v29 = vpop.permute.xlu0 %1490  ;;  %v1493_v13 = vpop.permute.xlu1 %1492 }
 0x22d   : > { %1565 = vst.msk [vmem:[#allocation3 + $0xb0] sm:$0xff] %vm1542_vm6, %v1491_v29  ;;  %v1983_v29 = vld [vmem:[#allocation2 + $0x12a] sm:$0xff] }
 0x22e   : > { %1566 = vst.msk [vmem:[#allocation3 + $0xb8] sm:$0xff] %vm1542_vm6, %v1493_v13  ;;  %2044 = vrot.lane.b32.xlu2 %v1971_v14, %s2816_s26  ;;  %v469_v14 = vld [vmem:[%s392_s28 + $0x8] sm:$0xff]  ;;  %v1799_v51 = vld [vmem:[#allocation2 + $0x199] sm:$0xff] }
 0x22f   : > { %472 = vst.msk [vmem:[#allocation2 + $0x1a1] sm:$0xff] %vm431_vm0, %v469_v14  ;;  %v1776_v14 = vld [vmem:[#allocation2 + $0x81] sm:$0xff] }
 0x230   : > { %v1643_v42 = vpop.permute.xlu2 %1642 }
 0x231   : > { %1738 = vst.msk [vmem:[#allocation3 + $0x8] sm:$0xff] %vm1736_vm7, %v1643_v42 }
 0x232   : > { %1676 = vrot.lane.b32.xlu0 %v1594_v26, %s2814_s23  ;;  %1678 = vrot.lane.b32.xlu1 %v1595_v41, %s2814_s23 }
 0x234   : > { %v1497_v49 = vpop.permute.xlu0 %1496  ;;  %v1499_v63 = vpop.permute.xlu1 %1498 }
 0x235   : > { %1568 = vst.msk [vmem:[#allocation3 + $0xc8] sm:$0xff] %vm1542_vm6, %v1497_v49 }
 0x236   : > { %1569 = vst.msk [vmem:[#allocation3 + $0xd0] sm:$0xff] %vm1542_vm6, %v1499_v63  ;;  %1692 = vrot.lane.b32.xlu2 %v1602_v31, %s2814_s23  ;;  %v1774_v31 = vld [vmem:[#allocation2 + $0x69] sm:$0xff]  ;;  %v1800_v15 = vld [vmem:[#allocation2 + $0x1a1] sm:$0xff] }
 0x238   : > { %v1649_v48 = vpop.permute.xlu2 %1648 }
 0x239   : > { %1741 = vst.msk [vmem:[#allocation3 + $0x20] sm:$0xff] %vm1736_vm7, %v1649_v48 }
 0x23a   : > { %1694 = vrot.lane.b32.xlu0 %v3356_v24, %s2814_s23  ;;  %1869 = vrot.lane.b32.xlu1 %v3546_v47, %s2815_s24  ;;  %v1980_v24 = vld [vmem:[#allocation2 + $0x10a] sm:$0xff] }
 0x23c   : > { %v1503_v21 = vpop.permute.xlu0 %1502  ;;  %v1505_v53 = vpop.permute.xlu1 %1504 }
 0x23d   : > { %1571 = vst.msk [vmem:[#allocation3 + $0xe0] sm:$0xff] %vm1542_vm6, %v1503_v21 }
 0x23e   : > { %1572 = vst.msk [vmem:[#allocation3 + $0xe8] sm:$0xff] %vm1542_vm6, %v1505_v53  ;;  %1871 = vrot.lane.b32.xlu2 %v1788_v1, %s2815_s24  ;;  %v1967_v53 = vld [vmem:[#allocation2 + $0x6a] sm:$0xff] }
 0x240   : > { %v1655_v12 = vpop.permute.xlu2 %1654 }
 0x241   : > { %1744 = vst.msk [vmem:[#allocation3 + $0x38] sm:$0xff] %vm1736_vm7, %v1655_v12  ;;  %v527_v12 = vld [vmem:[#allocation2 + $0x1a8] sm:$0x1] }
 0x242   : > { %1885 = vrot.lane.b32.xlu0 %v1795_v56, %s2815_s24  ;;  %1887 = vrot.lane.b32.xlu1 %v3579_v61, %s2815_s24  ;;  %545 = vst.msk [vmem:[#allocation2 + $0x1a9] sm:$0x1] %vm491_vm1, %v527_v12 }
 0x244   : > { %v1509_v47 = vpop.permute.xlu0 %1508  ;;  %v1641_v58 = vpop.permute.xlu1 %1640 }
 0x245   : > { %1574 = vst.msk [vmem:[#allocation3 + $0xf8] sm:$0xff] %vm1542_vm6, %v1509_v47 }
 0x246   : > { %1737 = vst.msk [vmem:[#allocation3] sm:$0xff] %vm1736_vm7, %v1641_v58  ;;  %2062 = vrot.lane.b32.xlu2 %v1980_v24, %s2816_s26  ;;  %v1974_v24 = vld [vmem:[#allocation2 + $0xc2] sm:$0xff] }
 0x248   : > { %v1661_v62 = vpop.permute.xlu2 %1660 }
 0x249   : > { %1747 = vst.msk [vmem:[#allocation3 + $0x50] sm:$0xff] %vm1736_vm7, %v1661_v62  ;;  %v1598_v62 = vld [vmem:[#allocation2 + $0x138] sm:$0xff] }
 0x24a   : > { %2064 = vrot.lane.b32.xlu0 %v1981_v54, %s2816_s26  ;;  %2078 = vrot.lane.b32.xlu1 %v1988_v5, %s2816_s26 }
 0x24c   : > { %v1645_v61 = vpop.permute.xlu0 %1644  ;;  %v1647_v16 = vpop.permute.xlu1 %1646 }
 0x24d   : > { %1739 = vst.msk [vmem:[#allocation3 + $0x10] sm:$0xff] %vm1736_vm7, %v1645_v61  ;;  %v1599_v61 = vld [vmem:[#allocation2 + $0x140] sm:$0xff] }
 0x24e   : > { %1740 = vst.msk [vmem:[#allocation3 + $0x18] sm:$0xff] %vm1736_vm7, %v1647_v16  ;;  %2080 = vrot.lane.b32.xlu2 %v1989_v34, %s2816_s26 }
 0x250   : > { %v1667_v39 = vpop.permute.xlu2 %1666 }
 0x251   : > { %1750 = vst.msk [vmem:[#allocation3 + $0x68] sm:$0xff] %vm1736_vm7, %v1667_v39 }
 0x252   : > { %1837 = vrot.lane.b32.xlu0 %v3490_v40, %s2815_s24  ;;  %1839 = vrot.lane.b32.xlu1 %v3497_v11, %s2815_s24  ;;  %v1965_v40 = vld [vmem:[#allocation2 + $0x52] sm:$0xff] }
 0x254   : > { %v1651_v2 = vpop.permute.xlu0 %1650  ;;  %v1653_v4 = vpop.permute.xlu1 %1652 }
 0x255   : > { %1742 = vst.msk [vmem:[#allocation3 + $0x28] sm:$0xff] %vm1736_vm7, %v1651_v2  ;;  %v1607_v2 = vld [vmem:[#allocation2 + $0x1a0] sm:$0xff] }
 0x256   : > { %1743 = vst.msk [vmem:[#allocation3 + $0x30] sm:$0xff] %vm1736_vm7, %v1653_v4  ;;  %1853 = vrot.lane.b32.xlu2 %v1779_v50, %s2815_s24 }
 0x258   : > { %v1675_v32 = vpop.permute.xlu2 %1674 }
 0x259   : > { %1754 = vst.msk [vmem:[#allocation3 + $0x88] sm:$0xff] %vm1736_vm7, %v1675_v32  ;;  %v1791_v32 = vld [vmem:[#allocation2 + $0x139] sm:$0xff] }
 0x25a   : > { %1855 = vrot.lane.b32.xlu0 %v1780_v22, %s2815_s24  ;;  %2030 = vrot.lane.b32.xlu1 %v1964_v60, %s2816_s26 }
 0x25c   : > { %v1657_v11 = vpop.permute.xlu0 %1656  ;;  %v1659_v10 = vpop.permute.xlu1 %1658 }
 0x25d   : > { %1745 = vst.msk [vmem:[#allocation3 + $0x40] sm:$0xff] %vm1736_vm7, %v1657_v11 }
 0x25e   : > { %1746 = vst.msk [vmem:[#allocation3 + $0x48] sm:$0xff] %vm1736_vm7, %v1659_v10  ;;  %2032 = vrot.lane.b32.xlu2 %v1965_v40, %s2816_s26 }
 0x260   : > { %v1866_v57 = vpop.permute.xlu2 %1865 }
 0x262   : > { %2046 = vrot.lane.b32.xlu0 %v3635_v45, %s2816_s26  ;;  %2048 = vrot.lane.b32.xlu1 %v1973_v44, %s2816_s26  ;;  %v2631_v45 = vld [vmem:[%s4145_s5 + $0x8] sm:$0xff] }
 0x263   : > { %2637 = vmatpush.bf16.msra.mxu2 %v2631_v45  ;;  %2638 = vmatpush.bf16.msra.mxu3 %v2631_v45 }
 0x264   : > { %v1663_v17 = vpop.permute.xlu0 %1662  ;;  %v1665_v23 = vpop.permute.xlu1 %1664  ;;  %2289 = vmatpush.bf16.msra.mxu0 %v2631_v45  ;;  %2636 = vmatpush.bf16.msra.mxu1 %v2631_v45  ;;  %v1984_v45 = vld [vmem:[#allocation2 + $0x13a] sm:$0xff] }
 0x265   : > { %1748 = vst.msk [vmem:[#allocation3 + $0x58] sm:$0xff] %vm1736_vm7, %v1663_v17 }
 0x266   : > { %1749 = vst.msk [vmem:[#allocation3 + $0x60] sm:$0xff] %vm1736_vm7, %v1665_v23  ;;  %1680 = vrot.lane.b32.xlu2 %v1596_v38, %s2814_s23 }
 0x267   : > { %2640 = vmatpush.bf16.msra.mxu2 %v2630_v8  ;;  %2641 = vmatpush.bf16.msra.mxu3 %v2630_v8 }
 0x268   : > { %v1884_v3 = vpop.permute.xlu2 %1883  ;;  %2290 = vmatpush.bf16.msra.mxu0 %v2630_v8  ;;  %2639 = vmatpush.bf16.msra.mxu1 %v2630_v8  ;;  %v1992_v8 = vld [vmem:[#allocation2 + $0x19a] sm:$0xff] }
 0x26a   : > { %1682 = vrot.lane.b32.xlu0 %v1597_v55, %s2814_s23  ;;  %1696 = vrot.lane.b32.xlu1 %v3468_v27, %s2814_s23  ;;  %v1789_v27 = vld [vmem:[#allocation2 + $0x121] sm:$0xff] }
 0x26b   : > { %v1985_v55 = vld [vmem:[#allocation2 + $0x142] sm:$0xff] }
 0x26c   : > { %v1669_v0 = vpop.permute.xlu0 %1668  ;;  %v1673_v6 = vpop.permute.xlu1 %1672 }
 0x26d   : > { %1751 = vst.msk [vmem:[#allocation3 + $0x70] sm:$0xff] %vm1736_vm7, %v1669_v0 }
 0x26e   : > { %1753 = vst.msk [vmem:[#allocation3 + $0x80] sm:$0xff] %vm1736_vm7, %v1673_v6  ;;  %1698 = vrot.lane.b32.xlu2 %v3475_v20, %s2814_s23  ;;  %v1982_v20 = vld [vmem:[#allocation2 + $0x122] sm:$0xff] }
 0x26f   : > { %1946 = vst.msk [vmem:[#allocation3 + $0x80] sm:$0xff] %vm1929_vm9, %v1866_v57  ;;  %v1792_v57 = vld [vmem:[#allocation2 + $0x141] sm:$0xff] }
 0x270   : > { %v2075_v43 = vpop.permute.xlu2 %2074 }
 0x272   : > { %1873 = vrot.lane.b32.xlu0 %v1789_v27, %s2815_s24  ;;  %1875 = vrot.lane.b32.xlu1 %v3557_v52, %s2815_s24  ;;  %v490_v52 = vld [vmem:[#allocation2 + $0x199] sm:$0x1]  ;;  %v1993_v27 = vld [vmem:[#allocation2 + $0x1a2] sm:$0xff] }
 0x273   : > { %509 = vst.msk [vmem:[#allocation2 + $0x198] sm:$0x1] %vm491_vm1, %v490_v52 }
 0x274   : > { %v1689_v9 = vpop.permute.xlu0 %1688  ;;  %v1691_v28 = vpop.permute.xlu1 %1690 }
 0x275   : > { %1761 = vst.msk [vmem:[#allocation3 + $0xc0] sm:$0xff] %vm1736_vm7, %v1689_v9  ;;  %v2372_v9 = vstv %s2210_s19  ;;  %s2742_s19 = scalar_lea.hbm %s2741_s14, 256 }
 0x276   : > { %1762 = vst.msk [vmem:[#allocation3 + $0xc8] sm:$0xff] %vm1736_vm7, %v1691_v28  ;;  %1889 = vrot.lane.b32.xlu2 %v3585_v7, %s2815_s24  ;;  %v2373_v28 = vmul.f32 1.442695, %v2372_v9  ;;  %p2743_p0 = scmp.ne.s32.totalorder %s2741_s14, %s2742_s19 }
 0x277   : > { %1955 = vst.msk [vmem:[#allocation3 + $0xc8] sm:$0xff] %vm1929_vm9, %v1884_v3 }
 0x278   : > { %v1836_v36 = vpop.permute.xlu2 %1835  ;;  %2712 = vpow2.f32 %v2373_v28  ;;  %p2744_p1 = pnand %p2743_p0, %p2906_p4 }
 0x279   : > { %1931 = vst.msk [vmem:[#allocation3 + $0x8] sm:$0xff] %vm1929_vm9, %v1836_v36 }
 0x27a   : > { %1891 = vrot.lane.b32.xlu0 %v3587_v59, %s2815_s24  ;;  %2066 = vrot.lane.b32.xlu1 %v1982_v20, %s2816_s26  ;;  %v1773_v59 = vld [vmem:[#allocation2 + $0x61] sm:$0xff]  ;;  %v1606_v50 = vld [vmem:[#allocation2 + $0x198] sm:$0xff]  ;;  %p2745_p2 = pneg %p2744_p1 }
 0x27b   : > { %v1775_v20 = vld [vmem:[#allocation2 + $0x79] sm:$0xff] }
 0x27c   : > { %v1868_v13 = vpop.permute.xlu0 %1867  ;;  %v1882_v26 = vpop.permute.xlu1 %1881 }
 0x27d   : > { %1947 = vst.msk [vmem:[#allocation3 + $0x88] sm:$0xff] %vm1929_vm9, %v1868_v13 }
 0x27e   : > { %1954 = vst.msk [vmem:[#allocation3 + $0xc0] sm:$0xff] %vm1929_vm9, %v1882_v26  ;;  %2068 = vrot.lane.b32.xlu2 %v1983_v29, %s2816_s26  ;;  %v1783_v29 = vld [vmem:[#allocation2 + $0xd9] sm:$0xff]  ;;  %v2713_v26 = vpop.eup %2712 }
 0x27f   : > { %2147 = vst.msk [vmem:[#allocation3 + $0xc0] sm:$0xff] %vm2122_vm10, %v2075_v43  ;;  %v1591_v43 = vld [vmem:[#allocation2 + $0xe0] sm:$0xff] }
 0x280   : > { %v2027_v7 = vpop.permute.xlu2 %2026  ;;  %2642 = vpush %v2713_v26 }
 0x282   : > { %2082 = vrot.lane.b32.xlu0 %v3692_v46, %s2816_s26  ;;  %2084 = vrot.lane.b32.xlu1 %v3698_v18, %s2816_s26  ;;  %v1782_v46 = vld [vmem:[#allocation2 + $0xc9] sm:$0xff] }
 0x284   : > { %v2059_v41 = vpop.permute.xlu0 %2058  ;;  %v2061_v42 = vpop.permute.xlu1 %2060 }
 0x285   : > { %2139 = vst.msk [vmem:[#allocation3 + $0x80] sm:$0xff] %vm2122_vm10, %v2059_v41  ;;  %v1784_v41 = vld [vmem:[#allocation2 + $0xe1] sm:$0xff] }
 0x286   : > { %2140 = vst.msk [vmem:[#allocation3 + $0x88] sm:$0xff] %vm2122_vm10, %v2061_v42  ;;  %1841 = vrot.lane.b32.xlu2 %v1773_v59, %s2815_s24 }
 0x288   : > { %v2045_v49 = vpop.permute.xlu2 %2044 }
 0x28a   : > { %1843 = vrot.lane.b32.xlu0 %v1774_v31, %s2815_s24  ;;  %1857 = vrot.lane.b32.xlu1 %v3527_v35, %s2815_s24  ;;  %v2179_v35 = vld [vmem:[#allocation3 + $0xc0] sm:$0xff] }
 0x28c   : > { %v2077_v63 = vpop.permute.xlu0 %2076  ;;  %v1834_v48 = vpop.permute.xlu1 %1833  ;;  %v2171_v18 = vld [vmem:[#allocation3 + $0x80] sm:$0xff] }
 0x28d   : > { %2148 = vst.msk [vmem:[#allocation3 + $0xc8] sm:$0xff] %vm2122_vm10, %v2077_v63  ;;  %v2172_v1 = vld [vmem:[#allocation3 + $0x88] sm:$0xff] }
 0x28e   : > { %1930 = vst.msk [vmem:[#allocation3] sm:$0xff] %vm1929_vm9, %v1834_v48  ;;  %v2195_v21 = vpack.c.bf16 %v2172_v1, %v2171_v18  ;;  %1859 = vrot.lane.b32.xlu2 %v1782_v46, %s2815_s24  ;;  %v1968_v18 = vld [vmem:[#allocation2 + $0x7a] sm:$0xff] }
 0x28f   : > { %2123 = vst.msk [vmem:[#allocation3] sm:$0xff] %vm2122_vm10, %v2027_v7 }
 0x290   : > { %2616 = vmatmul.msk.bf16.vlgmr.msra.gmra.mxu2 %vm2230_vm11, %v2195_v21  ;;  %v1693_v56 = vpop.permute.xlu2 %1692  ;;  %v1976_v21 = vld [vmem:[#allocation2 + $0xda] sm:$0xff] }
 0x291   : > { %1763 = vst.msk [vmem:[#allocation3 + $0xd0] sm:$0xff] %vm1736_vm7, %v1693_v56 }
 0x292   : > { %2034 = vrot.lane.b32.xlu0 %v3613_v19, %s2816_s26  ;;  %2036 = vrot.lane.b32.xlu1 %v1967_v53, %s2816_s26  ;;  %v1975_v19 = vld [vmem:[#allocation2 + $0xca] sm:$0xff] }
 0x294   : > { %v1850_v47 = vpop.permute.xlu0 %1849  ;;  %v1852_v58 = vpop.permute.xlu1 %1851  ;;  %v2180_v54 = vld [vmem:[#allocation3 + $0xc8] sm:$0xff] }
 0x295   : > { %1938 = vst.msk [vmem:[#allocation3 + $0x40] sm:$0xff] %vm1929_vm9, %v1850_v47  ;;  %v2199_v5 = vpack.c.bf16 %v2180_v54, %v2179_v35  ;;  %v1977_v35 = vld [vmem:[#allocation2 + $0xe2] sm:$0xff] }
 0x296   : > { %1939 = vst.msk [vmem:[#allocation3 + $0x48] sm:$0xff] %vm1929_vm9, %v1852_v58  ;;  %2050 = vrot.lane.b32.xlu2 %v1974_v24, %s2816_s26  ;;  %v2155_v22 = vld [vmem:[#allocation3] sm:$0xff] }
 0x297   : > { %2620 = vmatmul.msk.bf16.vlgmr.msra.gmra.mxu3 %vm2230_vm11, %v2199_v5  ;;  %2132 = vst.msk [vmem:[#allocation3 + $0x48] sm:$0xff] %vm2122_vm10, %v2045_v49 }
 0x298   : > { %v1872_v34 = vpop.permute.xlu2 %1871 }
 0x29a   : > { %2052 = vrot.lane.b32.xlu0 %v1975_v19, %s2816_s26  ;;  %1684 = vrot.lane.b32.xlu1 %v1598_v62, %s2814_s23 }
 0x29c   : > { %v2029_v16 = vpop.permute.xlu0 %2028  ;;  %v2043_v39 = vpop.permute.xlu1 %2042 }
 0x29d   : > { %2124 = vst.msk [vmem:[#allocation3 + $0x8] sm:$0xff] %vm2122_vm10, %v2029_v16 }
 0x29e   : > { %2131 = vst.msk [vmem:[#allocation3 + $0x40] sm:$0xff] %vm2122_vm10, %v2043_v39  ;;  %1686 = vrot.lane.b32.xlu2 %v1599_v61, %s2814_s23  ;;  %v2164_v60 = vld [vmem:[#allocation3 + $0x48] sm:$0xff] }
 0x2a0   : > { %v2063_v4 = vpop.permute.xlu2 %2062 }
 0x2a2   : > { %1700 = vrot.lane.b32.xlu0 %v1606_v50, %s2814_s23  ;;  %1702 = vrot.lane.b32.xlu1 %v1607_v2, %s2814_s23 }
 0x2a4   : > { %v1677_v40 = vpop.permute.xlu0 %1676  ;;  %v1679_v11 = vpop.permute.xlu1 %1678  ;;  %v2156_v10 = vld [vmem:[#allocation3 + $0x8] sm:$0xff] }
 0x2a5   : > { %1755 = vst.msk [vmem:[#allocation3 + $0x90] sm:$0xff] %vm1736_vm7, %v1677_v40  ;;  %v2187_v37 = vpack.c.bf16 %v2156_v10, %v2155_v22  ;;  %v2163_v44 = vld [vmem:[#allocation3 + $0x40] sm:$0xff] }
 0x2a6   : > { %1756 = vst.msk [vmem:[#allocation3 + $0x98] sm:$0xff] %vm1736_vm7, %v1679_v11  ;;  %v2191_v25 = vpack.c.bf16 %v2164_v60, %v2163_v44  ;;  %1877 = vrot.lane.b32.xlu2 %v1791_v32, %s2815_s24 }
 0x2a7   : > { %2608 = vmatmul.msk.bf16.vlgmr.msra.gmra.mxu0 %vm2230_vm11, %v2187_v37  ;;  %1949 = vst.msk [vmem:[#allocation3 + $0x98] sm:$0xff] %vm1929_vm9, %v1872_v34 }
 0x2a8   : > { %2612 = vmatmul.msk.bf16.vlgmr.msra.gmra.mxu1 %vm2230_vm11, %v2191_v25  ;;  %v2081_v38 = vpop.permute.xlu2 %2080 }
 0x2aa   : > { %1879 = vrot.lane.b32.xlu0 %v1792_v57, %s2815_s24  ;;  %1893 = vrot.lane.b32.xlu1 %v1799_v51, %s2815_s24 }
 0x2ac   : > { %v1695_v17 = vpop.permute.xlu0 %1694  ;;  %v1870_v23 = vpop.permute.xlu1 %1869 }
 0x2ad   : > { %1764 = vst.msk [vmem:[#allocation3 + $0xd8] sm:$0xff] %vm1736_vm7, %v1695_v17 }
 0x2ae   : > { %1948 = vst.msk [vmem:[#allocation3 + $0x90] sm:$0xff] %vm1929_vm9, %v1870_v23  ;;  %1895 = vrot.lane.b32.xlu2 %v1800_v15, %s2815_s24 }
 0x2af   : > { %2141 = vst.msk [vmem:[#allocation3 + $0x90] sm:$0xff] %vm2122_vm10, %v2063_v4 }
 0x2b0   : > { %v1854_v3 = vpop.permute.xlu2 %1853 }
 0x2b1   : > { %1940 = vst.msk [vmem:[#allocation3 + $0x50] sm:$0xff] %vm1929_vm9, %v1854_v3  ;;  %s2643_s21 = spop %2642 }
 0x2b2   : > { %2070 = vrot.lane.b32.xlu0 %v1984_v45, %s2816_s26  ;;  %2072 = vrot.lane.b32.xlu1 %v1985_v55, %s2816_s26 }
 0x2b4   : > { %v1886_v0 = vpop.permute.xlu0 %1885  ;;  %v1888_v6 = vpop.permute.xlu1 %1887 }
 0x2b5   : > { %1956 = vst.msk [vmem:[#allocation3 + $0xd0] sm:$0xff] %vm1929_vm9, %v1886_v0 }
 0x2b6   : > { %1957 = vst.msk [vmem:[#allocation3 + $0xd8] sm:$0xff] %vm1929_vm9, %v1888_v6  ;;  %2086 = vrot.lane.b32.xlu2 %v1992_v8, %s2816_s26  ;;  %v2173_v7 = vld [vmem:[#allocation3 + $0x90] sm:$0xff] }
 0x2b7   : > { %2150 = vst.msk [vmem:[#allocation3 + $0xd8] sm:$0xff] %vm2122_vm10, %v2081_v38 }
 0x2b8   : > { %v2033_v30 = vpop.permute.xlu2 %2032 }
 0x2ba   : > { %2088 = vrot.lane.b32.xlu0 %v1993_v27, %s2816_s26  ;;  %1670 = vrot.lane.b32.xlu1 %v1591_v43, %s2814_s23  ;;  %s354_s23 = sand.u32 1, %s2790_s8  }
 0x2bb   : > { %s2590_s22 = sshll.u32 %s354_s23, 8  ;;  %s2442_s10 = scalar_lea.sflag [#allocation8], %s354_s23 }
 0x2bc   : > { %v2065_v36 = vpop.permute.xlu0 %2064  ;;  %v2079_v52 = vpop.permute.xlu1 %2078  ;;  %s3985_s27 = scalar_lea.vmem [#allocation7], %s2590_s22 }
 0x2bd   : > { %2142 = vst.msk [vmem:[#allocation3 + $0x98] sm:$0xff] %vm2122_vm10, %v2065_v36  ;;  %v3977_v36 = vstv %s2643_s21  ;;  %s2456_s1 = sshll.u32 %s3985_s27, 4  ;;  %s2746_s21 = scalar_lea.hbm %s4147_s7, 512  ;;  %s2457_s1 = int_to_ptr.vmem [resolvable:$true] %s2456_s1 }
 0x2be   : > { %2149 = vst.msk [vmem:[#allocation3 + $0xd0] sm:$0xff] %vm2122_vm10, %v2079_v52  ;;  %1845 = vrot.lane.b32.xlu2 %v1775_v20, %s2815_s24  ;;  %v2182_v59 = vld [vmem:[#allocation3 + $0xd8] sm:$0xff]  ;;  %p2748_p5 = scmp.lt.s32.totalorder %s2746_s21, %s2742_s19 }
 0x2c0   : > { %v1681_v13 = vpop.permute.xlu2 %1680  ;;  %p2749_p6 = por %p2748_p5, %p2747_p3 }
 0x2c1   : > { %1757 = vst.msk [vmem:[#allocation3 + $0xa0] sm:$0xff] %vm1736_vm7, %v1681_v13 }
 0x2c2   : > { %1847 = vrot.lane.b32.xlu0 %v1776_v14, %s2815_s24  ;;  %1861 = vrot.lane.b32.xlu1 %v1783_v29, %s2815_s24  ;;  %p2750_p7 = pnand %p2749_p6, %p2745_p2 }
 0x2c4   : > { %v1838_v42 = vpop.permute.xlu0 %1837  ;;  %v1840_v31 = vpop.permute.xlu1 %1839  ;;  %v2174_v49 = vld [vmem:[#allocation3 + $0x98] sm:$0xff] }
 0x2c5   : > { %1932 = vst.msk [vmem:[#allocation3 + $0x10] sm:$0xff] %vm1929_vm9, %v1838_v42  ;;  %v2196_v46 = vpack.c.bf16 %v2174_v49, %v2173_v7  ;;  %v2181_v63 = vld [vmem:[#allocation3 + $0xd0] sm:$0xff] }
 0x2c6   : > { %1933 = vst.msk [vmem:[#allocation3 + $0x18] sm:$0xff] %vm1929_vm9, %v1840_v31  ;;  %v2200_v48 = vpack.c.bf16 %v2182_v59, %v2181_v63  ;;  %1863 = vrot.lane.b32.xlu2 %v1784_v41, %s2815_s24 }
 0x2c7   : > { %2617 = vmatmul.msk.bf16.gmra.mxu2 %vm2230_vm11, %v2196_v46  ;;  %2126 = vst.msk [vmem:[#allocation3 + $0x18] sm:$0xff] %vm2122_vm10, %v2033_v30  ;;  %v3973_v30 = vld [vmem:[%s4146_s6] ss:$0 sm:$0xff] }
 0x2c8   : > { %2621 = vmatmul.msk.bf16.gmra.mxu3 %vm2230_vm11, %v2200_v48  ;;  %v1699_v1 = vpop.permute.xlu2 %1698 }
 0x2c9   : > { %1766 = vst.msk [vmem:[#allocation3 + $0xe8] sm:$0xff] %vm1736_vm7, %v1699_v1 }
 0x2ca   : > { %2038 = vrot.lane.b32.xlu0 %v1968_v18, %s2816_s26  ;;  %2040 = vrot.lane.b32.xlu1 %v3624_v33, %s2816_s26 }
 0x2cc   : > { %v1856_v53 = vpop.permute.xlu0 %1855  ;;  %v2031_v56 = vpop.permute.xlu1 %2030 }
 0x2cd   : > { %1941 = vst.msk [vmem:[#allocation3 + $0x58] sm:$0xff] %vm1929_vm9, %v1856_v53 }
 0x2ce   : > { %2125 = vst.msk [vmem:[#allocation3 + $0x10] sm:$0xff] %vm2122_vm10, %v2031_v56  ;;  %2054 = vrot.lane.b32.xlu2 %v1976_v21, %s2816_s26  ;;  %v2158_v24 = vld [vmem:[#allocation3 + $0x18] sm:$0xff] }
 0x2d0   : > { %v1890_v12 = vpop.permute.xlu2 %1889 }
 0x2d2   : > { %2056 = vrot.lane.b32.xlu0 %v1977_v35, %s2816_s26 }
 0x2d4   : > { %v2047_v47 = vpop.permute.xlu0 %2046  ;;  %v2049_v58 = vpop.permute.xlu1 %2048 }
 0x2d5   : > { %2133 = vst.msk [vmem:[#allocation3 + $0x50] sm:$0xff] %vm2122_vm10, %v2047_v47  ;;  %v2157_v54 = vld [vmem:[#allocation3 + $0x10] sm:$0xff] }
 0x2d6   : > { %2134 = vst.msk [vmem:[#allocation3 + $0x58] sm:$0xff] %vm2122_vm10, %v2049_v58  ;;  %v2188_v33 = vpack.c.bf16 %v2158_v24, %v2157_v54 }
 0x2d8   : > { %2609 = vmatmul.msk.bf16.gmra.mxu0 %vm2230_vm11, %v2188_v33  ;;  %v2069_v5 = vpop.permute.xlu2 %2068 }
 0x2dc   : > { %v1683_v19 = vpop.permute.xlu0 %1682  ;;  %v1697_v62 = vpop.permute.xlu1 %1696  ;;  %v2165_v34 = vld [vmem:[#allocation3 + $0x50] sm:$0xff] }
 0x2dd   : > { %1758 = vst.msk [vmem:[#allocation3 + $0xa8] sm:$0xff] %vm1736_vm7, %v1683_v19  ;;  %v2166_v61 = vld [vmem:[#allocation3 + $0x58] sm:$0xff] }
 0x2de   : > { %1765 = vst.msk [vmem:[#allocation3 + $0xe0] sm:$0xff] %vm1736_vm7, %v1697_v62  ;;  %v2192_v16 = vpack.c.bf16 %v2166_v61, %v2165_v34 }
 0x2df   : > { %1958 = vst.msk [vmem:[#allocation3 + $0xe0] sm:$0xff] %vm1929_vm9, %v1890_v12 }
 0x2e0   : > { %2613 = vmatmul.msk.bf16.gmra.mxu1 %vm2230_vm11, %v2192_v16  ;;  %v1842_v39 = vpop.permute.xlu2 %1841 }
 0x2e1   : > { %1934 = vst.msk [vmem:[#allocation3 + $0x20] sm:$0xff] %vm1929_vm9, %v1842_v39 }
 0x2e4   : > { %v1874_v50 = vpop.permute.xlu0 %1873  ;;  %v1876_v2 = vpop.permute.xlu1 %1875 }
 0x2e5   : > { %1950 = vst.msk [vmem:[#allocation3 + $0xa0] sm:$0xff] %vm1929_vm9, %v1874_v50 }
 0x2e6   : > { %1951 = vst.msk [vmem:[#allocation3 + $0xa8] sm:$0xff] %vm1929_vm9, %v1876_v2 }
 0x2e7   : > { %2144 = vst.msk [vmem:[#allocation3 + $0xa8] sm:$0xff] %vm2122_vm10, %v2069_v5 }
 0x2e8   : > { %v1860_v4 = vpop.permute.xlu2 %1859 }
 0x2e9   : > { %1943 = vst.msk [vmem:[#allocation3 + $0x68] sm:$0xff] %vm1929_vm9, %v1860_v4 }
 0x2ec   : > { %v1892_v22 = vpop.permute.xlu0 %1891  ;;  %v2067_v60 = vpop.permute.xlu1 %2066 }
 0x2ed   : > { %1959 = vst.msk [vmem:[#allocation3 + $0xe8] sm:$0xff] %vm1929_vm9, %v1892_v22 }
 0x2ee   : > { %2143 = vst.msk [vmem:[#allocation3 + $0xa0] sm:$0xff] %vm2122_vm10, %v2067_v60  ;;  %v2176_v40 = vld [vmem:[#allocation3 + $0xa8] sm:$0xff] }
 0x2f0   : > { %v2051_v32 = vpop.permute.xlu2 %2050 }
 0x2f4   : > { %v2083_v11 = vpop.permute.xlu0 %2082  ;;  %v2085_v10 = vpop.permute.xlu1 %2084 }
 0x2f5   : > { %2151 = vst.msk [vmem:[#allocation3 + $0xe0] sm:$0xff] %vm2122_vm10, %v2083_v11  ;;  %v2175_v37 = vld [vmem:[#allocation3 + $0xa0] sm:$0xff] }
 0x2f6   : > { %2152 = vst.msk [vmem:[#allocation3 + $0xe8] sm:$0xff] %vm2122_vm10, %v2085_v10  ;;  %v2197_v44 = vpack.c.bf16 %v2176_v40, %v2175_v37 }
 0x2f8   : > { %2618 = vmatmul.msk.bf16.gmra.mxu2 %vm2230_vm11, %v2197_v44  ;;  %v1687_v25 = vpop.permute.xlu2 %1686 }
 0x2f9   : > { %1760 = vst.msk [vmem:[#allocation3 + $0xb8] sm:$0xff] %vm1736_vm7, %v1687_v25 }
 0x2fc   : > { %v1844_v57 = vpop.permute.xlu0 %1843  ;;  %v1858_v51 = vpop.permute.xlu1 %1857  ;;  %v2183_v38 = vld [vmem:[#allocation3 + $0xe0] sm:$0xff] }
 0x2fd   : > { %1935 = vst.msk [vmem:[#allocation3 + $0x28] sm:$0xff] %vm1929_vm9, %v1844_v57  ;;  %v2184_v15 = vld [vmem:[#allocation3 + $0xe8] sm:$0xff] }
 0x2fe   : > { %1942 = vst.msk [vmem:[#allocation3 + $0x60] sm:$0xff] %vm1929_vm9, %v1858_v51  ;;  %v2201_v17 = vpack.c.bf16 %v2184_v15, %v2183_v38 }
 0x2ff   : > { %2135 = vst.msk [vmem:[#allocation3 + $0x60] sm:$0xff] %vm2122_vm10, %v2051_v32 }
 0x300   : > { %2622 = vmatmul.msk.bf16.gmra.mxu3 %vm2230_vm11, %v2201_v17  ;;  %v1878_v23 = vpop.permute.xlu2 %1877 }
 0x304   : > { %v2035_v45 = vpop.permute.xlu0 %2034  ;;  %v2037_v55 = vpop.permute.xlu1 %2036 }
 0x305   : > { %2127 = vst.msk [vmem:[#allocation3 + $0x20] sm:$0xff] %vm2122_vm10, %v2035_v45 }
 0x306   : > { %2128 = vst.msk [vmem:[#allocation3 + $0x28] sm:$0xff] %vm2122_vm10, %v2037_v55  ;;  %v2167_v28 = vld [vmem:[#allocation3 + $0x60] sm:$0xff] }
 0x308   : > { %v1896_v3 = vpop.permute.xlu2 %1895 }
 0x30c   : > { %v2053_v8 = vpop.permute.xlu0 %2052  ;;  %v1685_v0 = vpop.permute.xlu1 %1684  ;;  %v2159_v6 = vld [vmem:[#allocation3 + $0x20] sm:$0xff] }
 0x30d   : > { %2136 = vst.msk [vmem:[#allocation3 + $0x68] sm:$0xff] %vm2122_vm10, %v2053_v8  ;;  %v2160_v27 = vld [vmem:[#allocation3 + $0x28] sm:$0xff] }
 0x30e   : > { %1759 = vst.msk [vmem:[#allocation3 + $0xb0] sm:$0xff] %vm1736_vm7, %v1685_v0  ;;  %v2189_v43 = vpack.c.bf16 %v2160_v27, %v2159_v6 }
 0x30f   : > { %1952 = vst.msk [vmem:[#allocation3 + $0xb0] sm:$0xff] %vm1929_vm9, %v1878_v23 }
 0x310   : > { %2610 = vmatmul.msk.bf16.gmra.mxu0 %vm2230_vm11, %v2189_v43  ;;  %v2087_v9 = vpop.permute.xlu2 %2086 }
 0x313   : > { %v2332_v20 = vpop.f32.mrf.mxu2 }
 0x314   : > { %v2333_v52 = vadd.f32 %v3973_v30, %v2332_v20  ;;  %v1701_v14 = vpop.permute.xlu0 %1700  ;;  %v1703_v29 = vpop.permute.xlu1 %1702  ;;  %v2168_v13 = vld [vmem:[#allocation3 + $0x68] sm:$0xff] }
 0x315   : > { %1767 = vst.msk [vmem:[#allocation3 + $0xf0] sm:$0xff] %vm1736_vm7, %v1701_v14  ;;  %v2193_v26 = vpack.c.bf16 %v2168_v13, %v2167_v28 }
 0x316   : > { %v2393_v7 = vmul.f32 %v3977_v36, %v2333_v52  ;;  %1768 = vst.msk [vmem:[#allocation3 + $0xf8] sm:$0xff] %vm1736_vm7, %v1703_v29 }
 0x317   : > { %2614 = vmatmul.msk.bf16.gmra.mxu1 %vm2230_vm11, %v2193_v26  ;;  %1961 = vst.msk [vmem:[#allocation3 + $0xf8] sm:$0xff] %vm1929_vm9, %v1896_v3 }
 0x318   : > { %2425 = vst [vmem:[%s3985_s27 + $0x80] sm:$0xff] %v2393_v7  ;;  %v1846_v59 = vpop.permute.xlu2 %1845 }
 0x319   : > { %1936 = vst.msk [vmem:[#allocation3 + $0x30] sm:$0xff] %vm1929_vm9, %v1846_v59 }
 0x31a   : > { %v2352_v41 = vpop.f32.mrf.mxu3 }
 0x31b   : > { %v2334_v42 = vpop.f32.mrf.mxu2  ;;  %v2353_v31 = vadd.f32 %v3973_v30, %v2352_v41 }
 0x31c   : > { %v2335_v49 = vadd.f32 %v3973_v30, %v2334_v42  ;;  %v1880_v46 = vpop.permute.xlu0 %1879  ;;  %v1894_v63 = vpop.permute.xlu1 %1893 }
 0x31d   : > { %v2401_v48 = vmul.f32 %v3977_v36, %v2353_v31  ;;  %1953 = vst.msk [vmem:[#allocation3 + $0xb8] sm:$0xff] %vm1929_vm9, %v1880_v46 }
 0x31e   : > { %v2394_v18 = vmul.f32 %v3977_v36, %v2335_v49  ;;  %1960 = vst.msk [vmem:[#allocation3 + $0xf0] sm:$0xff] %vm1929_vm9, %v1894_v63 }
 0x31f   : > { %2433 = vst [vmem:[%s3985_s27 + $0xc0] sm:$0xff] %v2401_v48 }
 0x320   : > { %2426 = vst [vmem:[%s3985_s27 + $0x88] sm:$0xff] %v2394_v18  ;;  %v1864_v5 = vpop.permute.xlu2 %1863 }
 0x321   : > { %2153 = vst.msk [vmem:[#allocation3 + $0xf0] sm:$0xff] %vm2122_vm10, %v2087_v9 }
 0x322   : > { %v2354_v1 = vpop.f32.mrf.mxu3 }
 0x323   : > { %v2355_v21 = vadd.f32 %v3973_v30, %v2354_v1 }
 0x324   : > { %v2071_v53 = vpop.permute.xlu0 %2070  ;;  %v2292_v56 = vpop.f32.mrf.mxu0 }
 0x325   : > { %v2402_v35 = vmul.f32 %v3977_v36, %v2355_v21  ;;  %2145 = vst.msk [vmem:[#allocation3 + $0xb0] sm:$0xff] %vm2122_vm10, %v2071_v53  ;;  %v2293_v12 = vadd.f32 %v3973_v30, %v2292_v56  ;;  %v2312_v24 = vpop.f32.mrf.mxu1  ;;  %v2073_v47 = vpop.permute.xlu1 %2072 }
 0x326   : > { %v2313_v58 = vadd.f32 %v3973_v30, %v2312_v24  ;;  %2146 = vst.msk [vmem:[#allocation3 + $0xb8] sm:$0xff] %vm2122_vm10, %v2073_v47 }
 0x327   : > { %2434 = vst [vmem:[%s3985_s27 + $0xc8] sm:$0xff] %v2402_v35  ;;  %v2377_v54 = vmul.f32 %v3977_v36, %v2293_v12 }
 0x328   : > { %v2385_v33 = vmul.f32 %v3977_v36, %v2313_v58  ;;  %v2185_v32 = vld [vmem:[#allocation3 + $0xf0] sm:$0xff]  ;;  %v2055_v10 = vpop.permute.xlu2 %2054 }
 0x329   : > { %2409 = vst [vmem:[%s3985_s27] sm:$0xff] %v2377_v54 }
 0x32a   : > { %2417 = vst [vmem:[%s3985_s27 + $0x40] sm:$0xff] %v2385_v33 }
 0x32c   : > { %v2089_v19 = vpop.permute.xlu0 %2088  ;;  %v2294_v62 = vpop.f32.mrf.mxu0  ;;  %v2177_v34 = vld [vmem:[#allocation3 + $0xb0] sm:$0xff] }
 0x32d   : > { %2154 = vst.msk [vmem:[#allocation3 + $0xf8] sm:$0xff] %vm2122_vm10, %v2089_v19  ;;  %v2295_v61 = vadd.f32 %v3973_v30, %v2294_v62  ;;  %v2314_v16 = vpop.f32.mrf.mxu1  ;;  %v1671_v39 = vpop.permute.xlu1 %1670  ;;  %v2178_v50 = vld [vmem:[#allocation3 + $0xb8] sm:$0xff] }
 0x32e   : > { %v2315_v2 = vadd.f32 %v3973_v30, %v2314_v16  ;;  %1752 = vst.msk [vmem:[#allocation3 + $0x78] sm:$0xff] %vm1736_vm7, %v1671_v39  ;;  %v2198_v4 = vpack.c.bf16 %v2178_v50, %v2177_v34 }
 0x32f   : > { %v2378_v22 = vmul.f32 %v3977_v36, %v2295_v61  ;;  %1945 = vst.msk [vmem:[#allocation3 + $0x78] sm:$0xff] %vm1929_vm9, %v1864_v5 }
 0x330   : > { %v2386_v60 = vmul.f32 %v3977_v36, %v2315_v2  ;;  %2619 = vmatmul.msk.bf16.gmra.mxu2 %vm2230_vm11, %v2198_v4 }
 0x331   : > { %2410 = vst [vmem:[%s3985_s27 + $0x8] sm:$0xff] %v2378_v22 }
 0x332   : > { %2418 = vst [vmem:[%s3985_s27 + $0x48] sm:$0xff] %v2386_v60 }
 0x334   : > { %v1848_v40 = vpop.permute.xlu0 %1847  ;;  %v2186_v11 = vld [vmem:[#allocation3 + $0xf8] sm:$0xff] }
 0x335   : > { %1937 = vst.msk [vmem:[#allocation3 + $0x38] sm:$0xff] %vm1929_vm9, %v1848_v40  ;;  %v1862_v37 = vpop.permute.xlu1 %1861  ;;  %v2202_v44 = vpack.c.bf16 %v2186_v11, %v2185_v32 }
 0x336   : > { %1944 = vst.msk [vmem:[#allocation3 + $0x70] sm:$0xff] %vm1929_vm9, %v1862_v37 }
 0x337   : > { %2623 = vmatmul.msk.bf16.gmra.mxu3 %vm2230_vm11, %v2202_v44  ;;  %2137 = vst.msk [vmem:[#allocation3 + $0x70] sm:$0xff] %vm2122_vm10, %v2055_v10 }
 0x33c   : > { %v2039_v25 = vpop.permute.xlu0 %2038 }
 0x33d   : > { %2129 = vst.msk [vmem:[#allocation3 + $0x30] sm:$0xff] %vm2122_vm10, %v2039_v25  ;;  %v2041_v57 = vpop.permute.xlu1 %2040 }
 0x33e   : > { %2130 = vst.msk [vmem:[#allocation3 + $0x38] sm:$0xff] %vm2122_vm10, %v2041_v57  ;;  %v2169_v45 = vld [vmem:[#allocation3 + $0x70] sm:$0xff] }
 0x344   : > { %v2057_v51 = vpop.permute.xlu0 %2056  ;;  %v2161_v38 = vld [vmem:[#allocation3 + $0x30] sm:$0xff] }
 0x345   : > { %2138 = vst.msk [vmem:[#allocation3 + $0x78] sm:$0xff] %vm2122_vm10, %v2057_v51  ;;  %v2162_v15 = vld [vmem:[#allocation3 + $0x38] sm:$0xff] }
 0x346   : > { %v2190_v17 = vpack.c.bf16 %v2162_v15, %v2161_v38 }
 0x348   : > { %2611 = vmatmul.msk.bf16.gmra.mxu0 %vm2230_vm11, %v2190_v17 }
 0x34a   : > { %v2337_v23 = vpop.f32.mrf.mxu2 }
 0x34b   : > { %v2338_v55 = vadd.f32 %v3973_v30, %v2337_v23  ;;  %v2357_v3 = vpop.f32.mrf.mxu3 }
 0x34c   : > { %v2358_v8 = vadd.f32 %v3973_v30, %v2357_v3  ;;  %v2170_v0 = vld [vmem:[#allocation3 + $0x78] sm:$0xff] }
 0x34d   : > { %v2395_v6 = vmul.f32 %v3977_v36, %v2338_v55  ;;  %v2194_v27 = vpack.c.bf16 %v2170_v0, %v2169_v45 }
 0x34e   : > { %v2403_v43 = vmul.f32 %v3977_v36, %v2358_v8 }
 0x34f   : > { %2427 = vst [vmem:[%s3985_s27 + $0x90] sm:$0xff] %v2395_v6  ;;  %2615 = vmatmul.msk.bf16.gmra.mxu1 %vm2230_vm11, %v2194_v27 }
 0x350   : > { %2435 = vst [vmem:[%s3985_s27 + $0xd0] sm:$0xff] %v2403_v43 }
 0x352   : > { %v2339_v9 = vpop.f32.mrf.mxu2 }
 0x353   : > { %v2340_v28 = vadd.f32 %v3973_v30, %v2339_v9  ;;  %v2359_v20 = vpop.f32.mrf.mxu3 }
 0x354   : > { %v2360_v52 = vadd.f32 %v3973_v30, %v2359_v20 }
 0x355   : > { %v2396_v14 = vmul.f32 %v3977_v36, %v2340_v28  ;;  %v2297_v29 = vpop.f32.mrf.mxu0 }
 0x356   : > { %v2404_v13 = vmul.f32 %v3977_v36, %v2360_v52  ;;  %v2298_v26 = vadd.f32 %v3973_v30, %v2297_v29 }
 0x357   : > { %2428 = vst [vmem:[%s3985_s27 + $0x98] sm:$0xff] %v2396_v14 }
 0x358   : > { %2436 = vst [vmem:[%s3985_s27 + $0xd8] sm:$0xff] %v2404_v13  ;;  %v2379_v7 = vmul.f32 %v3977_v36, %v2298_v26 }
 0x35a   : > { %2411 = vst [vmem:[%s3985_s27 + $0x10] sm:$0xff] %v2379_v7 }
 0x35d   : > { %v2299_v59 = vpop.f32.mrf.mxu0  ;;  %v2317_v41 = vpop.f32.mrf.mxu1 }
 0x35e   : > { %v2300_v42 = vadd.f32 %v3973_v30, %v2299_v59  ;;  %v2318_v31 = vadd.f32 %v3973_v30, %v2317_v41 }
 0x360   : > { %v2380_v49 = vmul.f32 %v3977_v36, %v2300_v42  ;;  %v2387_v46 = vmul.f32 %v3977_v36, %v2318_v31 }
 0x362   : > { %2412 = vst [vmem:[%s3985_s27 + $0x18] sm:$0xff] %v2380_v49 }
 0x363   : > { %2419 = vst [vmem:[%s3985_s27 + $0x50] sm:$0xff] %v2387_v46 }
 0x365   : > { %v2319_v63 = vpop.f32.mrf.mxu1 }
 0x366   : > { %v2320_v48 = vadd.f32 %v3973_v30, %v2319_v63 }
 0x368   : > { %v2388_v18 = vmul.f32 %v3977_v36, %v2320_v48 }
 0x36a   : > { %2420 = vst [vmem:[%s3985_s27 + $0x58] sm:$0xff] %v2388_v18 }
 0x37b   : > { %v2342_v1 = vpop.f32.mrf.mxu2 }
 0x37c   : > { %v2343_v21 = vadd.f32 %v3973_v30, %v2342_v1 }
 0x37e   : > { %v2397_v53 = vmul.f32 %v3977_v36, %v2343_v21 }
 0x380   : > { %2429 = vst [vmem:[%s3985_s27 + $0xa0] sm:$0xff] %v2397_v53 }
 0x383   : > { %v2344_v56 = vpop.f32.mrf.mxu2  ;;  %v2362_v35 = vpop.f32.mrf.mxu3 }
 0x384   : > { %v2345_v12 = vadd.f32 %v3973_v30, %v2344_v56  ;;  %v2363_v24 = vadd.f32 %v3973_v30, %v2362_v35 }
 0x386   : > { %v2398_v47 = vmul.f32 %v3977_v36, %v2345_v12  ;;  %v2405_v58 = vmul.f32 %v3977_v36, %v2363_v24 }
 0x388   : > { %2430 = vst [vmem:[%s3985_s27 + $0xa8] sm:$0xff] %v2398_v47 }
 0x389   : > { %2437 = vst [vmem:[%s3985_s27 + $0xe0] sm:$0xff] %v2405_v58 }
 0x38b   : > { %v2364_v54 = vpop.f32.mrf.mxu3 }
 0x38c   : > { %v2365_v33 = vadd.f32 %v3973_v30, %v2364_v54 }
 0x38d   : > { %v2302_v5 = vpop.f32.mrf.mxu0 }
 0x38e   : > { %v2406_v19 = vmul.f32 %v3977_v36, %v2365_v33  ;;  %v2303_v62 = vadd.f32 %v3973_v30, %v2302_v5 }
 0x390   : > { %2438 = vst [vmem:[%s3985_s27 + $0xe8] sm:$0xff] %v2406_v19  ;;  %v2381_v34 = vmul.f32 %v3977_v36, %v2303_v62 }
 0x392   : > { %2413 = vst [vmem:[%s3985_s27 + $0x20] sm:$0xff] %v2381_v34 }
 0x394   : > { %v2322_v61 = vpop.f32.mrf.mxu1 }
 0x395   : > { %v2304_v16 = vpop.f32.mrf.mxu0  ;;  %v2323_v39 = vadd.f32 %v3973_v30, %v2322_v61 }
 0x396   : > { %v2305_v50 = vadd.f32 %v3973_v30, %v2304_v16 }
 0x397   : > { %v2389_v2 = vmul.f32 %v3977_v36, %v2323_v39 }
 0x398   : > { %v2382_v4 = vmul.f32 %v3977_v36, %v2305_v50 }
 0x399   : > { %2421 = vst [vmem:[%s3985_s27 + $0x60] sm:$0xff] %v2389_v2 }
 0x39a   : > { %2414 = vst [vmem:[%s3985_s27 + $0x28] sm:$0xff] %v2382_v4 }
 0x39c   : > { %v2324_v22 = vpop.f32.mrf.mxu1 }
 0x39d   : > { %v2325_v60 = vadd.f32 %v3973_v30, %v2324_v22 }
 0x39f   : > { %v2390_v32 = vmul.f32 %v3977_v36, %v2325_v60 }
 0x3a1   : > { %2422 = vst [vmem:[%s3985_s27 + $0x68] sm:$0xff] %v2390_v32 }
 0x3b3   : > { %v2347_v40 = vpop.f32.mrf.mxu2 }
 0x3b4   : > { %v2348_v11 = vadd.f32 %v3973_v30, %v2347_v40 }
 0x3b6   : > { %v2399_v10 = vmul.f32 %v3977_v36, %v2348_v11 }
 0x3b8   : > { %2431 = vst [vmem:[%s3985_s27 + $0xb0] sm:$0xff] %v2399_v10 }
 0x3ba   : > { %v2367_v37 = vpop.f32.mrf.mxu3 }
 0x3bb   : > { %v2349_v44 = vpop.f32.mrf.mxu2  ;;  %v2368_v25 = vadd.f32 %v3973_v30, %v2367_v37 }
 0x3bc   : > { %v2350_v57 = vadd.f32 %v3973_v30, %v2349_v44 }
 0x3bd   : > { %v2407_v51 = vmul.f32 %v3977_v36, %v2368_v25 }
 0x3be   : > { %v2400_v38 = vmul.f32 %v3977_v36, %v2350_v57 }
 0x3bf   : > { %2439 = vst [vmem:[%s3985_s27 + $0xf0] sm:$0xff] %v2407_v51 }
 0x3c0   : > { %2432 = vst [vmem:[%s3985_s27 + $0xb8] sm:$0xff] %v2400_v38 }
 0x3c2   : > { %v2369_v15 = vpop.f32.mrf.mxu3 }
 0x3c3   : > { %v2370_v17 = vadd.f32 %v3973_v30, %v2369_v15 }
 0x3c5   : > { %v2408_v23 = vmul.f32 %v3977_v36, %v2370_v17  ;;  %v2307_v45 = vpop.f32.mrf.mxu0 }
 0x3c6   : > { %v2308_v55 = vadd.f32 %v3973_v30, %v2307_v45 }
 0x3c7   : > { %2440 = vst [vmem:[%s3985_s27 + $0xf8] sm:$0xff] %v2408_v23 }
 0x3c8   : > { %v2383_v3 = vmul.f32 %v3977_v36, %v2308_v55 }
 0x3ca   : > { %2415 = vst [vmem:[%s3985_s27 + $0x30] sm:$0xff] %v2383_v3 }
 0x3cc   : > { %v2327_v8 = vpop.f32.mrf.mxu1 }
 0x3cd   : > { %v2309_v0 = vpop.f32.mrf.mxu0  ;;  %v2328_v6 = vadd.f32 %v3973_v30, %v2327_v8 }
 0x3ce   : > { %v2310_v27 = vadd.f32 %v3973_v30, %v2309_v0 }
 0x3cf   : > { %v2391_v43 = vmul.f32 %v3977_v36, %v2328_v6 }
 0x3d0   : > { %v2384_v9 = vmul.f32 %v3977_v36, %v2310_v27 }
 0x3d1   : > { %2423 = vst [vmem:[%s3985_s27 + $0x70] sm:$0xff] %v2391_v43 }
 0x3d2   : > { %2416 = vst [vmem:[%s3985_s27 + $0x38] sm:$0xff] %v2384_v9 }
 0x3d4   : > { %v2329_v28 = vpop.f32.mrf.mxu1 }
 0x3d5   : > { %v2330_v20 = vadd.f32 %v3973_v30, %v2329_v28 }
 0x3d7   : > { %v2392_v52 = vmul.f32 %v3977_v36, %v2330_v20 }
 0x3d9   : > { %2424 = vst [vmem:[%s3985_s27 + $0x78] sm:$0xff] %v2392_v52 }
 0x3da   : > { %2753 = shalt.err (!%p2750_p7)
}
 0x3db   : > { %s2819_s23 = smov 128  }
 0x3dc   : > { %2644 = dma.vmem_to_hbm [thread:$0]  (%p2906_p4), %s2457_s1, 4096, %s2459_s12, %s2442_s10, %s2819_s23, %s2819_s23, %s2810_s16  }
 0x3dd PF: > { %p2650_p9 = scmp.ge.s32.totalorder %s2806_s11, 2  ;;  %s2473_s27 = sand.u32 1, %s2786_s30  }
 0x3de   : > { %s2474_s25 = scalar_lea.sflag [#allocation8], %s2473_s27 }
 0x3df   : > { %p2647_p10 = pnand %p2650_p9, %p2913_p8 }
 0x3e1   : > { %p2648_p11 = pneg %p2647_p10 }
 0x3e3   : > { %2781 = dma.done.wait (%p2648_p11), %s2474_s25, 4096  }
 0x3e4   : > { %2783 = vsyncadd (%p2648_p11), %s2474_s25, 4294963200  ;;  %s29_s11 = sadd.s32 1, %s2806_s11   ;;  %s4195_s30 = smov %s2790_s8 }
 0x3e5   : > { %p26_p12 = scmp.ge.s32.totalorder %s29_s11, 4   ;;  %s4196_s8 = smov %s2794_s9 }
 0x3e6   : > { %s4197_s9 = smov %s2919_s18  ;;  %s4198_s10 = smov %s2802_s0 }
 0x3e7   : > { %s4199_s0 = smov %s4201_s13  ;;  %28 = sbr.rel (!%p26_p12) target bundleno = 10 (0xa), region = 88 }
 0x3ec   :  { %2480 = vsyncpa [#allocation8], 1 }
 0x3ed   :  { %2482 = vsyncpa [#allocation8 + $0x1], 1 }

</bundles_post_ra>
